<compile_context>
chip_gen: v7x
topology: tpu7x:2x2x1
jax: 0.10.0
libtpu: 0.0.40
codegen_flags: <defaults>
</compile_context>

<pallas_src>
import functools

import jax
import jax.numpy as jnp
from jax.experimental import pallas as pl
from jax.experimental.pallas import tpu as pltpu

C_PAD = 128                      # lane-dense width for all channel dims
FUSED_MAX_NODES = 1024           # bf16 L_hat <= 2 MiB -> fully VMEM-resident fused kernel
_VMEM_LIMIT = 48 * 1024 * 1024   # below v7x's 64 MiB physical VMEM, above default scoped


def _round_up(x, m):
    return (x + m - 1) // m * m


def _pick_tile(n_pad):
    # 256-wide tiles match the v6e/v7x MXU and amortize per-grid-step overhead,
    # but keep >= 2 row blocks so both v7x TensorCores get work.
    if n_pad % 256 == 0 and n_pad // 256 >= 2:
        return 256
    return 128


def _tiled_compiler_params():
    return pltpu.CompilerParams(
        dimension_semantics=("parallel", "arbitrary"),
        vmem_limit_bytes=_VMEM_LIMIT,
    )


# ---------------------------------------------------------------------------
# Fused whole-model kernel (small / medium graphs): everything VMEM-resident
# ---------------------------------------------------------------------------

def fused_model_kernel(l_ref, x_ref,
                       w10_ref, w11_ref, w12_ref, b1_ref,
                       w20_ref, w21_ref, w22_ref, b2_ref,
                       out_ref):
    f32, bf16 = jnp.float32, jnp.bfloat16
    l = l_ref[...]                                   # bf16 [N, N]
    x = x_ref[...]                                   # bf16 [N, C_PAD]

    # ---- ChebConv layer 1 (weights pre-folded: W0'=W0-W2, W2'=2*W2) ----
    t1 = jnp.dot(l, x, preferred_element_type=f32).astype(bf16)      # T1 = L_hat @ X
    z1 = jnp.dot(l, t1, preferred_element_type=f32).astype(bf16)     # Z  = L_hat @ T1
    h = (jnp.dot(x, w10_ref[...], preferred_element_type=f32)
         + jnp.dot(t1, w11_ref[...], preferred_element_type=f32)
         + jnp.dot(z1, w12_ref[...], preferred_element_type=f32)
         + b1_ref[...])
    h = jnp.maximum(h, 0.0).astype(bf16)
    # TODO(synk): F.dropout(p=0.3) is identity at inference (training=False); omitted.

    # ---- ChebConv layer 2 ----
    t1b = jnp.dot(l, h, preferred_element_type=f32).astype(bf16)
    z2 = jnp.dot(l, t1b, preferred_element_type=f32).astype(bf16)
    out = (jnp.dot(h, w20_ref[...], preferred_element_type=f32)
           + jnp.dot(t1b, w21_ref[...], preferred_element_type=f32)
           + jnp.dot(z2, w22_ref[...], preferred_element_type=f32)
           + b2_ref[...])
    out_ref[...] = out.astype(out_ref.dtype)


def fused_forward(l_bf16, x_bf16, p):
    n_pad = l_bf16.shape[0]
    flops = 2 * 4 * n_pad * n_pad * C_PAD + 2 * 6 * n_pad * C_PAD * C_PAD
    bytes_acc = (n_pad * n_pad * 2 + n_pad * C_PAD * (2 + 4)
                 + 6 * C_PAD * C_PAD * 2 + 2 * C_PAD * 4)
    return pl.pallas_call(
        fused_model_kernel,
        out_shape=jax.ShapeDtypeStruct((n_pad, C_PAD), jnp.float32),
        compiler_params=pltpu.CompilerParams(vmem_limit_bytes=_VMEM_LIMIT),
        cost_estimate=pl.CostEstimate(flops=int(flops), transcendentals=0,
                                      bytes_accessed=int(bytes_acc)),
    )(l_bf16, x_bf16,
      p["w1_0"], p["w1_1"], p["w1_2"], p["b1"],
      p["w2_0"], p["w2_1"], p["w2_2"], p["b2"])


# ---------------------------------------------------------------------------
# Tiled kernels (large graphs): (row-block, reduction-block) grid over L_hat
# ---------------------------------------------------------------------------

def propagate_kernel(l_ref, hpan_ref, y_ref, acc_ref, *, tk):
    """One (row-tile, reduction-tile) step of Y = L_hat @ H.

    hpan_ref is the whole feature panel, VMEM-resident (constant index_map);
    the reduction tile is sliced in-kernel -> no per-row-block re-DMA of H.
    """
    k = pl.program_id(1)

    @pl.when(k == 0)
    def _():
        acc_ref[...] = jnp.zeros_like(acc_ref)

    ks = pl.multiple_of(k * tk, tk)
    acc_ref[...] += jnp.dot(l_ref[...], hpan_ref[pl.ds(ks, tk), :],
                            preferred_element_type=jnp.float32)

    @pl.when(k == pl.num_programs(1) - 1)
    def _():
        y_ref[...] = acc_ref[...].astype(y_ref.dtype)


def cheb_layer_kernel(l_ref, t1pan_ref, t0_ref, w0_ref, w1_ref, w2_ref, b_ref,
                      out_ref, acc_ref, *, tm, tk, apply_relu):
    """Second Chebyshev propagation fused with the K=3 channel combine.

    acc accumulates Z = L_hat @ T1; on the final reduction step (weights are
    pre-folded on the host: W0' = W0 - W2, W2' = 2*W2):
        out = T0 @ W0' + T1 @ W1 + Z @ W2' + b   (+ ReLU)
    The T1 row tile is sliced from the resident panel (no duplicate DMA stream).
    """
    i = pl.program_id(0)
    k = pl.program_id(1)

    @pl.when(k == 0)
    def _():
        acc_ref[...] = jnp.zeros_like(acc_ref)

    ks = pl.multiple_of(k * tk, tk)
    acc_ref[...] += jnp.dot(l_ref[...], t1pan_ref[pl.ds(ks, tk), :],
                            preferred_element_type=jnp.float32)

    @pl.when(k == pl.num_programs(1) - 1)
    def _():
        rs = pl.multiple_of(i * tm, tm)
        t1_row = t1pan_ref[pl.ds(rs, tm), :]
        z = acc_ref[...].astype(jnp.bfloat16)
        out = (jnp.dot(t0_ref[...], w0_ref[...], preferred_element_type=jnp.float32)
               + jnp.dot(t1_row, w1_ref[...], preferred_element_type=jnp.float32)
               + jnp.dot(z, w2_ref[...], preferred_element_type=jnp.float32)
               + b_ref[...])
        if apply_relu:
            out = jnp.maximum(out, 0.0)
        out_ref[...] = out.astype(out_ref.dtype)


def propagate(l_bf16, h_bf16):
    """Y = L_hat @ H (bf16 in / bf16 out, f32 accumulation)."""
    n_pad = l_bf16.shape[0]
    t = _pick_tile(n_pad)
    grid = (n_pad // t, n_pad // t)
    flops = 2 * n_pad * n_pad * C_PAD
    bytes_acc = n_pad * n_pad * 2 + 2 * n_pad * C_PAD * 2
    return pl.pallas_call(
        functools.partial(propagate_kernel, tk=t),
        out_shape=jax.ShapeDtypeStruct((n_pad, C_PAD), jnp.bfloat16),
        grid_spec=pltpu.PrefetchScalarGridSpec(
            num_scalar_prefetch=0,
            grid=grid,
            in_specs=[
                pl.BlockSpec((t, t), lambda i, k: (i, k)),           # L_hat tile (bf16)
                pl.BlockSpec((n_pad, C_PAD), lambda i, k: (0, 0)),   # resident H panel
            ],
            out_specs=pl.BlockSpec((t, C_PAD), lambda i, k: (i, 0)),
            scratch_shapes=[pltpu.VMEM((t, C_PAD), jnp.float32)]),
        compiler_params=_tiled_compiler_params(),
        cost_estimate=pl.CostEstimate(flops=int(flops), transcendentals=0,
                                      bytes_accessed=int(bytes_acc)),
    )(l_bf16, h_bf16)


def cheb_layer(l_bf16, t1_bf16, t0_bf16, w0, w1, w2, b, *, apply_relu, out_dtype):
    """One ChebConv layer given precomputed T1 = L_hat @ T0 (2nd propagate fused)."""
    n_pad = l_bf16.shape[0]
    t = _pick_tile(n_pad)
    grid = (n_pad // t, n_pad // t)
    flops = 2 * n_pad * n_pad * C_PAD + 3 * 2 * n_pad * C_PAD * C_PAD
    bytes_acc = (n_pad * n_pad * 2 + 2 * n_pad * C_PAD * 2
                 + 3 * C_PAD * C_PAD * 2 + C_PAD * 4
                 + n_pad * C_PAD * jnp.dtype(out_dtype).itemsize)
    kernel = functools.partial(cheb_layer_kernel, tm=t, tk=t, apply_relu=apply_relu)
    return pl.pallas_call(
        kernel,
        out_shape=jax.ShapeDtypeStruct((n_pad, C_PAD), out_dtype),
        grid_spec=pltpu.PrefetchScalarGridSpec(
            num_scalar_prefetch=0,
            grid=grid,
            in_specs=[
                pl.BlockSpec((t, t), lambda i, k: (i, k)),            # L_hat tile
                pl.BlockSpec((n_pad, C_PAD), lambda i, k: (0, 0)),    # resident T1 panel
                pl.BlockSpec((t, C_PAD), lambda i, k: (i, 0)),        # T0 row tile
                pl.BlockSpec((C_PAD, C_PAD), lambda i, k: (0, 0)),    # W0' = W0 - W2
                pl.BlockSpec((C_PAD, C_PAD), lambda i, k: (0, 0)),    # W1
                pl.BlockSpec((C_PAD, C_PAD), lambda i, k: (0, 0)),    # W2' = 2*W2
                pl.BlockSpec((1, C_PAD), lambda i, k: (0, 0)),        # bias
            ],
            out_specs=pl.BlockSpec((t, C_PAD), lambda i, k: (i, 0)),
            scratch_shapes=[pltpu.VMEM((t, C_PAD), jnp.float32)]),
        compiler_params=_tiled_compiler_params(),
        cost_estimate=pl.CostEstimate(flops=int(flops), transcendentals=0,
                                      bytes_accessed=int(bytes_acc)),
    )(l_bf16, t1_bf16, t0_bf16, w0, w1, w2, b)


def tiled_forward(l_bf16, x_bf16, p):
    """Multi-call path for graphs too large to hold L_hat resident in VMEM."""
    t1 = propagate(l_bf16, x_bf16)                                   # T1 = L_hat @ X (bf16)
    h = cheb_layer(l_bf16, t1, x_bf16, p["w1_0"], p["w1_1"], p["w1_2"], p["b1"],
                   apply_relu=True, out_dtype=jnp.bfloat16)
    # TODO(synk): F.dropout(p=0.3) is identity at inference (training=False); omitted.
    t1b = propagate(l_bf16, h)
    return cheb_layer(l_bf16, t1b, h, p["w2_0"], p["w2_1"], p["w2_2"], p["b2"],
                      apply_relu=False, out_dtype=jnp.float32)


def cheb_conv_model_forward(l_bf16, x_bf16, params):
    """Full ChebConvModel forward on padded operands. Returns [N_pad, C_PAD] f32."""
    n_pad = l_bf16.shape[0]
    if n_pad <= FUSED_MAX_NODES:
        return fused_forward(l_bf16, x_bf16, params)
    return tiled_forward(l_bf16, x_bf16, params)


# ---------------------------------------------------------------------------
# Graph / parameter construction (plain JAX glue)
# ---------------------------------------------------------------------------

def build_scaled_laplacian(edge_index, num_nodes):
    """Dense L_hat = 2/lambda_max * L_sym - I with lambda_max=2 (PyG ChebConv default).

    Self-loops removed, duplicate edges summed, degree keyed by edge_index[0]
    (matches torch_geometric.utils.get_laplacian; demo graph is undirected).
    """
    src, dst = edge_index[0], edge_index[1]
    adj = jnp.zeros((num_nodes, num_nodes), jnp.float32)
    adj = adj.at[dst, src].add(1.0)                                  # adj[target, source]
    adj = adj * (1.0 - jnp.eye(num_nodes, dtype=jnp.float32))        # remove self-loops
    deg = jnp.sum(adj, axis=0)                                       # degree by source node
    d_inv_sqrt = jnp.where(deg > 0, jax.lax.rsqrt(deg), 0.0)
    return -(d_inv_sqrt[:, None] * adj * d_inv_sqrt[None, :])


def init_params(key, in_channels, hidden_channels, out_channels):
    """Glorot-init ChebConv weights (K=3) + small biases, zero-padded to C_PAD lanes."""
    ks = jax.random.split(key, 8)

    def glorot_padded(k, fan_in, fan_out):
        limit = jnp.sqrt(6.0 / (fan_in + fan_out))
        w = jax.random.uniform(k, (fan_in, fan_out), jnp.float32, -limit, limit)
        return jnp.zeros((C_PAD, C_PAD), jnp.float32).at[:fan_in, :fan_out].set(w)

    def bias_padded(k, fan_out):
        b = jax.random.uniform(k, (fan_out,), jnp.float32, -0.1, 0.1)
        return jnp.zeros((1, C_PAD), jnp.float32).at[0, :fan_out].set(b)

    return {
        "w1_0": glorot_padded(ks[0], in_channels, hidden_channels),
        "w1_1": glorot_padded(ks[1], in_channels, hidden_channels),
        "w1_2": glorot_padded(ks[2], in_channels, hidden_channels),
        "b1": bias_padded(ks[3], hidden_channels),
        "w2_0": glorot_padded(ks[4], hidden_channels, out_channels),
        "w2_1": glorot_padded(ks[5], hidden_channels, out_channels),
        "w2_2": glorot_padded(ks[6], hidden_channels, out_channels),
        "b2": bias_padded(ks[7], out_channels),
    }


def fold_params(raw):
    """Fold the Chebyshev recurrence into the weights and cast to bf16 for the MXU:
       T0@W0 + T1@W1 + (2Z - T0)@W2  ==  T0@(W0 - W2) + T1@W1 + Z@(2*W2)."""
    def fold(w0, w1, w2):
        return ((w0 - w2).astype(jnp.bfloat16),
                w1.astype(jnp.bfloat16),
                (2.0 * w2).astype(jnp.bfloat16))

    w10, w11, w12 = fold(raw["w1_0"], raw["w1_1"], raw["w1_2"])
    w20, w21, w22 = fold(raw["w2_0"], raw["w2_1"], raw["w2_2"])
    return {"w1_0": w10, "w1_1": w11, "w1_2": w12, "b1": raw["b1"],
            "w2_0": w20, "w2_1": w21, "w2_2": w22, "b2": raw["b2"]}


def reference_forward(l_bf16, x_bf16, raw):
    """Pure-JAX f32 reference (HIGHEST-precision matmuls, unfolded Chebyshev form)
    consuming the same bf16-quantized L / X / weights that are handed to the kernels."""
    dot = functools.partial(jnp.dot, precision=jax.lax.Precision.HIGHEST)
    q = lambda w: w.astype(jnp.bfloat16).astype(jnp.float32)
    l = l_bf16.astype(jnp.float32)

    def cheb(t0, w0, w1, w2, b):
        t1 = dot(l, t0)
        t2 = 2.0 * dot(l, t1) - t0
        return dot(t0, q(w0)) + dot(t1, q(w1)) + dot(t2, q(w2)) + b

    x = x_bf16.astype(jnp.float32)
    h = jnp.maximum(cheb(x, raw["w1_0"], raw["w1_1"], raw["w1_2"], raw["b1"]), 0.0)
    return cheb(h, raw["w2_0"], raw["w2_1"], raw["w2_2"], raw["b2"])


# ---------------------------------------------------------------------------
# Demo
# ---------------------------------------------------------------------------

if __name__ == "__main__":
    key = jax.random.PRNGKey(0)
    k_x, k_e, k_p = jax.random.split(key, 3)

    num_nodes, in_ch, hid_ch, out_ch, num_edges = 200, 8, 32, 4, 600

    # node features [N, Cin]
    x = jax.random.normal(k_x, (num_nodes, in_ch), jnp.float32)

    # random undirected edge_index [2, 2E] (both directions present, typical usage)
    e = jax.random.randint(k_e, (2, num_edges), 0, num_nodes, jnp.int32)
    edge_index = jnp.concatenate([e, e[::-1]], axis=1)

    n_pad = _round_up(num_nodes, 256)

    # scaled Laplacian, zero-padded and cast to bf16 (what the kernels consume)
    l_hat = build_scaled_laplacian(edge_index, num_nodes)
    l_pad = jnp.zeros((n_pad, n_pad), jnp.float32).at[:num_nodes, :num_nodes].set(l_hat)
    l_bf16 = l_pad.astype(jnp.bfloat16)

    # node features zero-padded to (n_pad, C_PAD), bf16
    x_pad = jnp.zeros((n_pad, C_PAD), jnp.float32).at[:num_nodes, :in_ch].set(x)
    x_bf16 = x_pad.astype(jnp.bfloat16)

    raw_params = init_params(k_p, in_ch, hid_ch, out_ch)
    kernel_params = fold_params(raw_params)

    ref = reference_forward(l_bf16, x_bf16, raw_params)[:num_nodes, :out_ch]

    # fused single-kernel path (auto-selected for this size: L_hat resident in VMEM)
    fwd = jax.jit(cheb_conv_model_forward)
    out_fused = jax.block_until_ready(fwd(l_bf16, x_bf16, kernel_params))
    out_fused = out_fused[:num_nodes, :out_ch]

    # tiled multi-call path (used for large graphs); exercised here for coverage
    fwd_tiled = jax.jit(tiled_forward)
    out_tiled = jax.block_until_ready(fwd_tiled(l_bf16, x_bf16, kernel_params))
    out_tiled = out_tiled[:num_nodes, :out_ch]

    for name, out in (("fused", out_fused), ("tiled", out_tiled)):
        assert out.shape == (num_nodes, out_ch)
        max_err = float(jnp.max(jnp.abs(out - ref)))
        assert jnp.allclose(out, ref, atol=5e-2, rtol=5e-2), \
            f"{name} path mismatch vs reference, max_err={max_err:.3e}"

    print("KERNEL_OK")
</pallas_src>

<mosaic_0001>
module attributes {stable_mosaic.version = 11 : i64} {
  func.func @fused_model_kernel(%arg0: memref<256x256xbf16, #tpu.memory_space<vmem>>, %arg1: memref<256x128xbf16, #tpu.memory_space<vmem>>, %arg2: memref<128x128xbf16, #tpu.memory_space<vmem>>, %arg3: memref<128x128xbf16, #tpu.memory_space<vmem>>, %arg4: memref<128x128xbf16, #tpu.memory_space<vmem>>, %arg5: memref<1x128xf32, #tpu.memory_space<vmem>>, %arg6: memref<128x128xbf16, #tpu.memory_space<vmem>>, %arg7: memref<128x128xbf16, #tpu.memory_space<vmem>>, %arg8: memref<128x128xbf16, #tpu.memory_space<vmem>>, %arg9: memref<1x128xf32, #tpu.memory_space<vmem>>, %arg10: memref<256x128xf32, #tpu.memory_space<vmem>>) attributes {dimension_semantics = [], scalar_prefetch = 0 : i64, scratch_operands = 0 : i64, tpu.core_type = #tpu.core_type<tc>} {
    %c0 = arith.constant 0 : index
    %c0_0 = arith.constant 0 : index
    %0 = vector.load %arg0[%c0, %c0_0] : memref<256x256xbf16, #tpu.memory_space<vmem>>, vector<256x256xbf16>
    %c0_1 = arith.constant 0 : index
    %c0_2 = arith.constant 0 : index
    %1 = vector.load %arg1[%c0_1, %c0_2] : memref<256x128xbf16, #tpu.memory_space<vmem>>, vector<256x128xbf16>
    %cst = arith.constant dense<0.000000e+00> : vector<256x128xf32>
    %2 = tpu.matmul %0, %1, %cst {dimension_numbers = #tpu.dot_dimension_numbers<[1], [0], [0], [1], [0, 0, 1, 1], [], []>} : vector<256x256xbf16>, vector<256x128xbf16>, vector<256x128xf32> -> vector<256x128xf32>
    %3 = arith.truncf %2 : vector<256x128xf32> to vector<256x128xbf16>
    %cst_3 = arith.constant dense<0.000000e+00> : vector<256x128xf32>
    %4 = tpu.matmul %0, %3, %cst_3 {dimension_numbers = #tpu.dot_dimension_numbers<[1], [0], [0], [1], [0, 0, 1, 1], [], []>} : vector<256x256xbf16>, vector<256x128xbf16>, vector<256x128xf32> -> vector<256x128xf32>
    %5 = arith.truncf %4 : vector<256x128xf32> to vector<256x128xbf16>
    %c0_4 = arith.constant 0 : index
    %c0_5 = arith.constant 0 : index
    %6 = vector.load %arg2[%c0_4, %c0_5] : memref<128x128xbf16, #tpu.memory_space<vmem>>, vector<128x128xbf16>
    %cst_6 = arith.constant dense<0.000000e+00> : vector<256x128xf32>
    %7 = tpu.matmul %1, %6, %cst_6 {dimension_numbers = #tpu.dot_dimension_numbers<[1], [0], [0], [1], [0, 0, 1, 1], [], []>} : vector<256x128xbf16>, vector<128x128xbf16>, vector<256x128xf32> -> vector<256x128xf32>
    %c0_7 = arith.constant 0 : index
    %c0_8 = arith.constant 0 : index
    %8 = vector.load %arg3[%c0_7, %c0_8] : memref<128x128xbf16, #tpu.memory_space<vmem>>, vector<128x128xbf16>
    %cst_9 = arith.constant dense<0.000000e+00> : vector<256x128xf32>
    %9 = tpu.matmul %3, %8, %cst_9 {dimension_numbers = #tpu.dot_dimension_numbers<[1], [0], [0], [1], [0, 0, 1, 1], [], []>} : vector<256x128xbf16>, vector<128x128xbf16>, vector<256x128xf32> -> vector<256x128xf32>
    %10 = arith.addf %7, %9 : vector<256x128xf32>
    %c0_10 = arith.constant 0 : index
    %c0_11 = arith.constant 0 : index
    %11 = vector.load %arg4[%c0_10, %c0_11] : memref<128x128xbf16, #tpu.memory_space<vmem>>, vector<128x128xbf16>
    %cst_12 = arith.constant dense<0.000000e+00> : vector<256x128xf32>
    %12 = tpu.matmul %5, %11, %cst_12 {dimension_numbers = #tpu.dot_dimension_numbers<[1], [0], [0], [1], [0, 0, 1, 1], [], []>} : vector<256x128xbf16>, vector<128x128xbf16>, vector<256x128xf32> -> vector<256x128xf32>
    %13 = arith.addf %10, %12 : vector<256x128xf32>
    %c0_13 = arith.constant 0 : index
    %c0_14 = arith.constant 0 : index
    %14 = vector.load %arg5[%c0_13, %c0_14] : memref<1x128xf32, #tpu.memory_space<vmem>>, vector<1x128xf32>
    %15 = vector.broadcast %14 : vector<1x128xf32> to vector<256x128xf32>
    %16 = arith.addf %13, %15 : vector<256x128xf32>
    %cst_15 = arith.constant 0.000000e+00 : f32
    %17 = vector.broadcast %cst_15 : f32 to vector<256x128xf32>
    %18 = arith.maximumf %16, %17 : vector<256x128xf32>
    %19 = arith.truncf %18 : vector<256x128xf32> to vector<256x128xbf16>
    %cst_16 = arith.constant dense<0.000000e+00> : vector<256x128xf32>
    %20 = tpu.matmul %0, %19, %cst_16 {dimension_numbers = #tpu.dot_dimension_numbers<[1], [0], [0], [1], [0, 0, 1, 1], [], []>} : vector<256x256xbf16>, vector<256x128xbf16>, vector<256x128xf32> -> vector<256x128xf32>
    %21 = arith.truncf %20 : vector<256x128xf32> to vector<256x128xbf16>
    %cst_17 = arith.constant dense<0.000000e+00> : vector<256x128xf32>
    %22 = tpu.matmul %0, %21, %cst_17 {dimension_numbers = #tpu.dot_dimension_numbers<[1], [0], [0], [1], [0, 0, 1, 1], [], []>} : vector<256x256xbf16>, vector<256x128xbf16>, vector<256x128xf32> -> vector<256x128xf32>
    %23 = arith.truncf %22 : vector<256x128xf32> to vector<256x128xbf16>
    %c0_18 = arith.constant 0 : index
    %c0_19 = arith.constant 0 : index
    %24 = vector.load %arg6[%c0_18, %c0_19] : memref<128x128xbf16, #tpu.memory_space<vmem>>, vector<128x128xbf16>
    %cst_20 = arith.constant dense<0.000000e+00> : vector<256x128xf32>
    %25 = tpu.matmul %19, %24, %cst_20 {dimension_numbers = #tpu.dot_dimension_numbers<[1], [0], [0], [1], [0, 0, 1, 1], [], []>} : vector<256x128xbf16>, vector<128x128xbf16>, vector<256x128xf32> -> vector<256x128xf32>
    %c0_21 = arith.constant 0 : index
    %c0_22 = arith.constant 0 : index
    %26 = vector.load %arg7[%c0_21, %c0_22] : memref<128x128xbf16, #tpu.memory_space<vmem>>, vector<128x128xbf16>
    %cst_23 = arith.constant dense<0.000000e+00> : vector<256x128xf32>
    %27 = tpu.matmul %21, %26, %cst_23 {dimension_numbers = #tpu.dot_dimension_numbers<[1], [0], [0], [1], [0, 0, 1, 1], [], []>} : vector<256x128xbf16>, vector<128x128xbf16>, vector<256x128xf32> -> vector<256x128xf32>
    %28 = arith.addf %25, %27 : vector<256x128xf32>
    %c0_24 = arith.constant 0 : index
    %c0_25 = arith.constant 0 : index
    %29 = vector.load %arg8[%c0_24, %c0_25] : memref<128x128xbf16, #tpu.memory_space<vmem>>, vector<128x128xbf16>
    %cst_26 = arith.constant dense<0.000000e+00> : vector<256x128xf32>
    %30 = tpu.matmul %23, %29, %cst_26 {dimension_numbers = #tpu.dot_dimension_numbers<[1], [0], [0], [1], [0, 0, 1, 1], [], []>} : vector<256x128xbf16>, vector<128x128xbf16>, vector<256x128xf32> -> vector<256x128xf32>
    %31 = arith.addf %28, %30 : vector<256x128xf32>
    %c0_27 = arith.constant 0 : index
    %c0_28 = arith.constant 0 : index
    %32 = vector.load %arg9[%c0_27, %c0_28] : memref<1x128xf32, #tpu.memory_space<vmem>>, vector<1x128xf32>
    %33 = vector.broadcast %32 : vector<1x128xf32> to vector<256x128xf32>
    %34 = arith.addf %31, %33 : vector<256x128xf32>
    %c0_29 = arith.constant 0 : index
    %c0_30 = arith.constant 0 : index
    %35 = vector.load %arg10[%c0_29, %c0_30] : memref<256x128xf32, #tpu.memory_space<vmem>>, vector<256x128xf32>
    tpu.vector_store %arg10[%c0_29, %c0_30], %34 {strides = array<i32>} : memref<256x128xf32, #tpu.memory_space<vmem>>, vector<256x128xf32>,
    return
  }
}

</mosaic_0001>

<bundles_post_ra>
// kernel: cheb_conv_model_forward.1
= control target key start
LH: loop header
LB: loop body
LE: loop exit
PB: predicated region body
PF: predicated region fallthrough
CT: control target
= control target key end

     0   :  { %15 = vsyncpa [#allocation3], 0  ;;  %s5000_s0 = inlined_call_operand.hbm [shape: bf16[256,256], index: 0, kind: input, shape index: {}]   ;;  %s5001_s1 = inlined_call_operand.hbm [shape: bf16[256,128], index: 1, kind: input, shape index: {}]   ;;  %s5002_s2 = inlined_call_operand.hbm [shape: bf16[128,128], index: 2, kind: input, shape index: {}]   ;;  %s5003_s3 = inlined_call_operand.hbm [shape: bf16[128,128], index: 3, kind: input, shape index: {}]   ;;  %s5004_s4 = inlined_call_operand.hbm [shape: bf16[128,128], index: 4, kind: input, shape index: {}]   ;;  %s5005_s5 = inlined_call_operand.vmem [shape: f32[1,128], index: 5, kind: input, shape index: {}]   ;;  %s5006_s6 = inlined_call_operand.hbm [shape: bf16[128,128], index: 6, kind: input, shape index: {}]   ;;  %s5007_s7 = inlined_call_operand.hbm [shape: bf16[128,128], index: 7, kind: input, shape index: {}]   ;;  %s5008_s8 = inlined_call_operand.hbm [shape: bf16[128,128], index: 8, kind: input, shape index: {}]   ;;  %s5009_s9 = inlined_call_operand.vmem [shape: f32[1,128], index: 9, kind: input, shape index: {}]   ;;  %s5010_s10 = inlined_call_operand.hbm [shape: f32[256,128], index: 10, kind: output, shape index: {}]  }
   0x1   :  { %16 = vsyncpa [#allocation6], 0 }
   0x2   :  { %17 = vsyncpa [#allocation9], 0 }
   0x3   :  { %18 = vsyncpa [#allocation12], 0 }
   0x4   :  { %19 = vsyncpa [#allocation15], 0 }
   0x5   :  { %20 = vsyncpa [#allocation4], 0  ;;  %s4256_s13 = smov [#allocation5]   ;;  %s4046_s17 = scalar_lea.hbm %s5001_s1, 2048 }
   0x6   :  { %s38_s14 = sshll.u32 %s4256_s13, 4  ;;  %p4047_p0 = scmp.ne.s32.totalorder %s5001_s1, %s4046_s17  ;;  %s39_s14 = int_to_ptr.vmem [resolvable:$true] %s38_s14 }
   0x7   :  { %p4050_p1 = scmp.lt.u32.totalorder %s4046_s17, %s5001_s1 }
   0x9   :  { %p4052_p2 = pnand %p4050_p1, %p4047_p0 }
   0xb   :  { %4055 = shalt.err (!%p4052_p2)
}
   0xc   :  { %s4056_s22 = scalar_lea.vmem %s39_s14, 2048  ;;  %p4061_p4 = scmp.lt.s32.totalorder %s39_s14, %s39_s14 }
   0xd   :  { %p4057_p3 = scmp.ne.s32.totalorder %s39_s14, %s4056_s22  ;;  %p4062_p5 = scmp.lt.s32.totalorder %s4056_s22, %s4056_s22 }
   0xf   :  { %p4063_p6 = por %p4062_p5, %p4061_p4 }
  0x11   :  { %p4064_p7 = pnand %p4063_p6, %p4057_p3 }
  0x13   :  { %4067 = shalt.err (!%p4064_p7)
}
  0x14   :  { %s4257_s23 = smov 64   ;;  %s4258_s24 = smov 4  }
  0x15   :  { %44 = dma.hbm_to_vmem [thread:$0]  %s5001_s1, 2048, %s39_s14, [#allocation6], %s4257_s23, %s4257_s23, %s4258_s24  }
  0x16   :  { %s4259_s27 = smov [#allocation8]   ;;  %s4260_s29 = smov [#allocation11]  }
  0x17   :  { %s62_s28 = sshll.u32 %s4259_s27, 4  ;;  %s88_s30 = sshll.u32 %s4260_s29, 4  ;;  %s63_s28 = int_to_ptr.vmem [resolvable:$true] %s62_s28  ;;  %s89_s30 = int_to_ptr.vmem [resolvable:$true] %s88_s30 }
  0x18   :  { %s4068_s13 = scalar_lea.hbm %s5003_s3, 1024 }
  0x19   :  { %p4069_p8 = scmp.ne.s32.totalorder %s5003_s3, %s4068_s13  ;;  %p4072_p9 = scmp.lt.u32.totalorder %s4068_s13, %s5003_s3 }
  0x1b   :  { %p4074_p10 = pnand %p4072_p9, %p4069_p8 }
  0x1d   :  { %4077 = shalt.err (!%p4074_p10)
}
  0x1e   :  { %s4078_s1 = scalar_lea.vmem %s63_s28, 1024  ;;  %p4083_p12 = scmp.lt.s32.totalorder %s63_s28, %s63_s28 }
  0x1f   :  { %p4079_p11 = scmp.ne.s32.totalorder %s63_s28, %s4078_s1  ;;  %p4084_p13 = scmp.lt.s32.totalorder %s4078_s1, %s4078_s1 }
  0x21   :  { %p4085_p0 = por %p4084_p13, %p4083_p12 }
  0x23   :  { %p4086_p1 = pnand %p4085_p0, %p4079_p11 }
  0x25   :  { %4089 = shalt.err (!%p4086_p1)
}
  0x26   :  { %68 = dma.hbm_to_vmem [thread:$0]  %s5003_s3, 1024, %s63_s28, [#allocation9], %s4257_s23, %s4257_s23, %s4258_s24  }
  0x27   :  { %s4090_s22 = scalar_lea.hbm %s5006_s6, 1024 }
  0x28   :  { %p4091_p2 = scmp.ne.s32.totalorder %s5006_s6, %s4090_s22  ;;  %p4094_p3 = scmp.lt.u32.totalorder %s4090_s22, %s5006_s6 }
  0x2a   :  { %p4096_p4 = pnand %p4094_p3, %p4091_p2 }
  0x2c   :  { %4099 = shalt.err (!%p4096_p4)
}
  0x2d   :  { %s4100_s11 = scalar_lea.vmem %s89_s30, 1024  ;;  %p4105_p6 = scmp.lt.s32.totalorder %s89_s30, %s89_s30 }
  0x2e   :  { %p4101_p5 = scmp.ne.s32.totalorder %s89_s30, %s4100_s11  ;;  %p4106_p7 = scmp.lt.s32.totalorder %s4100_s11, %s4100_s11 }
  0x30   :  { %p4107_p8 = por %p4106_p7, %p4105_p6 }
  0x32   :  { %p4108_p9 = pnand %p4107_p8, %p4101_p5 }
  0x34   :  { %4111 = shalt.err (!%p4108_p9)
}
  0x35   :  { %94 = dma.hbm_to_vmem [thread:$0]  %s5006_s6, 1024, %s89_s30, [#allocation12], %s4257_s23, %s4257_s23, %s4258_s24  }
  0x36   :  { %s4261_s12 = smov [#allocation2]   ;;  %s4112_s17 = scalar_lea.hbm %s5000_s0, 4096 }
  0x37   :  { %s26_s13 = sshll.u32 %s4261_s12, 4  ;;  %p4113_p10 = scmp.ne.s32.totalorder %s5000_s0, %s4112_s17  ;;  %s27_s13 = int_to_ptr.vmem [resolvable:$true] %s26_s13 }
  0x38   :  { %p4116_p11 = scmp.lt.u32.totalorder %s4112_s17, %s5000_s0 }
  0x3a   :  { %p4118_p12 = pnand %p4116_p11, %p4113_p10 }
  0x3c   :  { %4121 = shalt.err (!%p4118_p12)
}
  0x3d   :  { %s4122_s20 = scalar_lea.vmem %s27_s13, 4096  ;;  %p4127_p0 = scmp.lt.s32.totalorder %s27_s13, %s27_s13 }
  0x3e   :  { %p4123_p13 = scmp.ne.s32.totalorder %s27_s13, %s4122_s20  ;;  %p4128_p1 = scmp.lt.s32.totalorder %s4122_s20, %s4122_s20 }
  0x40   :  { %p4129_p2 = por %p4128_p1, %p4127_p0 }
  0x42   :  { %p4130_p3 = pnand %p4129_p2, %p4123_p13 }
  0x44   :  { %4133 = shalt.err (!%p4130_p3)
}
  0x45   :  { %s4262_s6 = smov 128   ;;  %s4263_s30 = smov 8  }
  0x46   :  { %32 = dma.hbm_to_vmem [thread:$0]  %s5000_s0, 4096, %s27_s13, [#allocation3], %s4262_s6, %s4262_s6, %s4263_s30  }
  0x47   :  { %s4264_s25 = smov [#allocation7]   ;;  %s4265_s27 = smov [#allocation10]  }
  0x48   :  { %s50_s26 = sshll.u32 %s4264_s25, 4  ;;  %s74_s29 = sshll.u32 %s4265_s27, 4  ;;  %s51_s26 = int_to_ptr.vmem [resolvable:$true] %s50_s26  ;;  %s4384_s29 = int_to_ptr.vmem [resolvable:$true] %s74_s29 }
  0x49   :  { %s4134_s28 = scalar_lea.hbm %s5002_s2, 1024 }
  0x4a   :  { %p4135_p4 = scmp.ne.s32.totalorder %s5002_s2, %s4134_s28  ;;  %p4138_p5 = scmp.lt.u32.totalorder %s4134_s28, %s5002_s2 }
  0x4c   :  { %p4140_p6 = pnand %p4138_p5, %p4135_p4 }
  0x4e   :  { %4143 = shalt.err (!%p4140_p6)
}
  0x4f   :  { %s4144_s0 = scalar_lea.vmem %s51_s26, 1024  ;;  %p4149_p8 = scmp.lt.s32.totalorder %s51_s26, %s51_s26 }
  0x50   :  { %p4145_p7 = scmp.ne.s32.totalorder %s51_s26, %s4144_s0  ;;  %p4150_p9 = scmp.lt.s32.totalorder %s4144_s0, %s4144_s0 }
  0x52   :  { %p4151_p10 = por %p4150_p9, %p4149_p8 }
  0x54   :  { %p4152_p11 = pnand %p4151_p10, %p4145_p7 }
  0x56   :  { %4155 = shalt.err (!%p4152_p11)
}
  0x57   :  { %56 = dma.hbm_to_vmem [thread:$0]  %s5002_s2, 1024, %s51_s26, [#allocation6], %s4257_s23, %s4257_s23, %s4258_s24  }
  0x58   :  { %s4156_s19 = scalar_lea.hbm %s5004_s4, 1024 }
  0x59   :  { %p4157_p12 = scmp.ne.s32.totalorder %s5004_s4, %s4156_s19  ;;  %p4160_p13 = scmp.lt.u32.totalorder %s4156_s19, %s5004_s4 }
  0x5b   :  { %p4162_p0 = pnand %p4160_p13, %p4157_p12 }
  0x5d   :  { %4165 = shalt.err (!%p4162_p0)
}
  0x5e   :  { %s4166_s27 = scalar_lea.vmem %s4384_s29, 1024  ;;  %p4171_p2 = scmp.lt.s32.totalorder %s4384_s29, %s4384_s29 }
  0x5f   :  { %p4167_p1 = scmp.ne.s32.totalorder %s4384_s29, %s4166_s27  ;;  %p4172_p3 = scmp.lt.s32.totalorder %s4166_s27, %s4166_s27 }
  0x61   :  { %p4173_p4 = por %p4172_p3, %p4171_p2 }
  0x63   :  { %p4174_p5 = pnand %p4173_p4, %p4167_p1 }
  0x65   :  { %4177 = shalt.err (!%p4174_p5)
}
  0x66   :  { %80 = dma.hbm_to_vmem [thread:$0]  %s5004_s4, 1024, %s4384_s29, [#allocation9], %s4257_s23, %s4257_s23, %s4258_s24  }
  0x67   :  { %s4266_s11 = smov [#allocation13]   ;;  %s4267_s28 = smov [#allocation14]  }
  0x68   :  { %s100_s3 = sshll.u32 %s4266_s11, 4  ;;  %s112_s12 = sshll.u32 %s4267_s28, 4  ;;  %s101_s3 = int_to_ptr.vmem [resolvable:$true] %s100_s3  ;;  %s4421_s12 = int_to_ptr.vmem [resolvable:$true] %s112_s12 }
  0x69   :  { %s4178_s17 = scalar_lea.hbm %s5007_s7, 1024 }
  0x6a   :  { %p4179_p6 = scmp.ne.s32.totalorder %s5007_s7, %s4178_s17  ;;  %p4182_p7 = scmp.lt.u32.totalorder %s4178_s17, %s5007_s7 }
  0x6c   :  { %p4184_p8 = pnand %p4182_p7, %p4179_p6 }
  0x6e   :  { %4187 = shalt.err (!%p4184_p8)
}
  0x6f   :  { %s4188_s4 = scalar_lea.vmem %s101_s3, 1024  ;;  %p4193_p10 = scmp.lt.s32.totalorder %s101_s3, %s101_s3 }
  0x70   :  { %p4189_p9 = scmp.ne.s32.totalorder %s101_s3, %s4188_s4  ;;  %p4194_p11 = scmp.lt.s32.totalorder %s4188_s4, %s4188_s4 }
  0x72   :  { %p4195_p12 = por %p4194_p11, %p4193_p10 }
  0x74   :  { %p4196_p13 = pnand %p4195_p12, %p4189_p9 }
  0x76   :  { %4199 = shalt.err (!%p4196_p13)
}
  0x77   :  { %106 = dma.hbm_to_vmem [thread:$0]  %s5007_s7, 1024, %s101_s3, [#allocation12], %s4257_s23, %s4257_s23, %s4258_s24  }
  0x78   :  { %s4200_s21 = scalar_lea.hbm %s5008_s8, 1024 }
  0x79   :  { %p4201_p0 = scmp.ne.s32.totalorder %s5008_s8, %s4200_s21  ;;  %p4204_p1 = scmp.lt.u32.totalorder %s4200_s21, %s5008_s8 }
  0x7b   :  { %p4206_p2 = pnand %p4204_p1, %p4201_p0 }
  0x7d   :  { %4209 = shalt.err (!%p4206_p2)
}
  0x7e   :  { %s4210_s26 = scalar_lea.vmem %s4421_s12, 1024  ;;  %p4215_p4 = scmp.lt.s32.totalorder %s4421_s12, %s4421_s12 }
  0x7f   :  { %p4211_p3 = scmp.ne.s32.totalorder %s4421_s12, %s4210_s26  ;;  %p4216_p5 = scmp.lt.s32.totalorder %s4210_s26, %s4210_s26 }
  0x81   :  { %p4217_p6 = por %p4216_p5, %p4215_p4 }
  0x83   :  { %p4218_p7 = pnand %p4217_p6, %p4211_p3 }
  0x85   :  { %4221 = shalt.err (!%p4218_p7)
}
  0x86   :  { %118 = dma.hbm_to_vmem [thread:$0]  %s5008_s8, 1024, %s4421_s12, [#allocation15], %s4257_s23, %s4257_s23, %s4258_s24  }
  0x87   :  { %4244 = dma.done.wait [#allocation3], 4096  }
  0x88   :  { %4245 = vsyncadd [#allocation3], 4294963200 }
  0x89   :  { %4246 = dma.done.wait [#allocation6], 3072  }
  0x8a   :  { %4247 = vsyncadd [#allocation6], 4294964224 }
  0x8b   :  { %4248 = dma.done.wait [#allocation9], 2048  }
  0x8c   :  { %4249 = vsyncadd [#allocation9], 4294965248 }
  0x8d   :  { %4250 = dma.done.wait [#allocation12], 2048  }
  0x8e   :  { %4251 = vsyncadd [#allocation12], 4294965248 }
  0x8f   :  { %4252 = dma.done.wait [#allocation15], 1024  }
  0x90   :  { %4253 = vsyncadd [#allocation15], 4294966272  ;;  %v4458_v0 = vld [vmem:[#allocation5 + $0x40] sm:$0xff]   ;;  %v4464_v2 = vld [vmem:[#allocation5 + $0x48] sm:$0xff]  }
  0x91   :  { %v4460_v1 = vld [vmem:[#allocation5] sm:$0xff]   ;;  %2865 = vmatprep.subr.bf16.mxu0 %v4458_v0  ;;  %3745 = vmatprep.subr.bf16.mxu1 %v4458_v0  ;;  %v4468_v3 = vld [vmem:[#allocation5 + $0x8] sm:$0xff]   ;;  %v4472_v4 = vld [vmem:[#allocation5 + $0x50] sm:$0xff]  }
  0x92   :  { %2866 = vmatpush3.bf16.msra.mxu0 %v4460_v1  ;;  %3753 = vmatpush3.bf16.msra.mxu1 %v4460_v1  ;;  %v4476_v5 = vld [vmem:[#allocation5 + $0x10] sm:$0xff]   ;;  %v4480_v6 = vld [vmem:[#allocation5 + $0x58] sm:$0xff]   ;;  %v4488_v8 = vld [vmem:[#allocation5 + $0x60] sm:$0xff]  }
  0x93   :  { %2867 = vmatprep.subr.bf16.mxu0 %v4464_v2  ;;  %3746 = vmatprep.subr.bf16.mxu1 %v4464_v2  ;;  %v4484_v7 = vld [vmem:[#allocation5 + $0x18] sm:$0xff]   ;;  %v4490_v9 = vld [vmem:[#allocation5 + $0x20] sm:$0xff]   ;;  %v4494_v10 = vld [vmem:[#allocation5 + $0x68] sm:$0xff]  }
  0x94   :  { %5031 = vst [vmem:[#allocation23_spill] sm:$0xff] %v4494_v10  ;;  %v4498_v11 = vld [vmem:[#allocation2 + $0x4] ss:$8 sps:$4 sm:$0xff]   ;;  %v4509_v14 = vld [vmem:[#allocation5 + $0x70] sm:$0xff]   ;;  %v4518_v16 = vld [vmem:[#allocation5 + $0x78] sm:$0xff]  }
  0x95   :  { %5032 = vst [vmem:[#allocation24_spill] sm:$0xff] %v4498_v11  ;;  %v4500_v12 = vld [vmem:[#allocation2 + $0x84] ss:$8 sps:$4 sm:$0xff]   ;;  %498 = vmatprep.mubr.bf16.mxu0 %v4498_v11  ;;  %5033 = vst [vmem:[#allocation25_spill] sm:$0xff] %v4509_v14  ;;  %v4514_v15 = vld [vmem:[#allocation5 + $0x30] sm:$0xff]  }
  0x96   :  { %2868 = vmatpush3.bf16.msra.mxu0 %v4468_v3  ;;  %3754 = vmatpush3.bf16.msra.mxu1 %v4468_v3  ;;  %v4505_v13 = vld [vmem:[#allocation5 + $0x28] sm:$0xff]   ;;  %5034 = vst [vmem:[#allocation26_spill] sm:$0xff] %v4518_v16  ;;  %v4522_v17 = vld [vmem:[#allocation5 + $0x38] sm:$0xff]   ;;  %v3966_v25 = vld [vmem:[#allocation8] sm:$0xff]  }
  0x97   :  { %2869 = vmatprep.subr.bf16.mxu0 %v4472_v4  ;;  %3747 = vmatprep.subr.bf16.mxu1 %v4472_v4  ;;  %v4526_v18 = vld [vmem:[#allocation2] ss:$8 sps:$4 sm:$0xff]   ;;  %v4532_v20 = vld [vmem:[#allocation2 + $0x14] ss:$8 sps:$4 sm:$0xff]   ;;  %v4540_v22 = vld [vmem:[#allocation2 + $0x10] ss:$8 sps:$4 sm:$0xff]  }
  0x98   :  { %562 = vmatprep.mubr.bf16.mxu1 %v4500_v12  ;;  %v4528_v19 = vld [vmem:[#allocation2 + $0x80] ss:$8 sps:$4 sm:$0xff]   ;;  %v4534_v21 = vld [vmem:[#allocation2 + $0x94] ss:$8 sps:$4 sm:$0xff]   ;;  %v4542_v23 = vld [vmem:[#allocation2 + $0x90] ss:$8 sps:$4 sm:$0xff]  }
  0x99   :  { %v4544_v24 = vld [vmem:[#allocation2 + $0x24] ss:$8 sps:$4 sm:$0xff]   ;;  %v3968_v28 = vld [vmem:[#allocation8 + $0x10] sm:$0xff]   ;;  %v4552_v29 = vld [vmem:[#allocation2 + $0x20] ss:$8 sps:$4 sm:$0xff]  }
  0x9a   :  { %2870 = vmatpush3.bf16.msra.mxu0 %v4476_v5  ;;  %3755 = vmatpush3.bf16.msra.mxu1 %v4476_v5  ;;  %v4546_v26 = vld [vmem:[#allocation2 + $0xa4] ss:$8 sps:$4 sm:$0xff]   ;;  %v4554_v30 = vld [vmem:[#allocation2 + $0xa0] ss:$8 sps:$4 sm:$0xff]   ;;  %v4556_v31 = vld [vmem:[#allocation2 + $0x34] ss:$8 sps:$4 sm:$0xff]  }
  0x9b   :  { %2871 = vmatprep.subr.bf16.mxu0 %v4480_v6  ;;  %3748 = vmatprep.subr.bf16.mxu1 %v4480_v6  ;;  %v3967_v27 = vld [vmem:[#allocation8 + $0x8] sm:$0xff]   ;;  %v4558_v32 = vld [vmem:[#allocation2 + $0xb4] ss:$8 sps:$4 sm:$0xff]   ;;  %v4564_v34 = vld [vmem:[#allocation2 + $0x30] ss:$8 sps:$4 sm:$0xff]  }
  0x9c   :  { %v3969_v33 = vld [vmem:[#allocation8 + $0x18] sm:$0xff]   ;;  %v4568_v36 = vld [vmem:[#allocation2 + $0x44] ss:$8 sps:$4 sm:$0xff]   ;;  %v4576_v38 = vld [vmem:[#allocation2 + $0x40] ss:$8 sps:$4 sm:$0xff]  }
  0x9d   :  { %v4566_v35 = vld [vmem:[#allocation2 + $0xb0] ss:$8 sps:$4 sm:$0xff]   ;;  %v4570_v37 = vld [vmem:[#allocation2 + $0xc4] ss:$8 sps:$4 sm:$0xff]   ;;  %v4578_v39 = vld [vmem:[#allocation2 + $0xc0] ss:$8 sps:$4 sm:$0xff]  }
  0x9e   :  { %2872 = vmatpush3.bf16.msra.mxu0 %v4484_v7  ;;  %3756 = vmatpush3.bf16.msra.mxu1 %v4484_v7  ;;  %5035 = vst [vmem:[#allocation27_spill] sm:$0xff] %v4566_v35  ;;  %5036 = vst [vmem:[#allocation28_spill] sm:$0xff] %v4570_v37  ;;  %v4580_v40 = vld [vmem:[#allocation2 + $0x54] ss:$8 sps:$4 sm:$0xff]   ;;  %v4588_v42 = vld [vmem:[#allocation2 + $0x50] ss:$8 sps:$4 sm:$0xff]  }
  0x9f   :  { %2873 = vmatprep.subr.bf16.mxu0 %v4488_v8  ;;  %3749 = vmatprep.subr.bf16.mxu1 %v4488_v8  ;;  %5037 = vst [vmem:[#allocation29_spill] sm:$0xff] %v4578_v39  ;;  %v4582_v41 = vld [vmem:[#allocation2 + $0xd4] ss:$8 sps:$4 sm:$0xff]   ;;  %v4590_v43 = vld [vmem:[#allocation2 + $0xd0] ss:$8 sps:$4 sm:$0xff]   ;;  %v3970_v52 = vld [vmem:[#allocation8 + $0x20] sm:$0xff]  }
  0xa0   :  { %5038 = vst [vmem:[#allocation30_spill] sm:$0xff] %v4582_v41  ;;  %5039 = vst [vmem:[#allocation31_spill] sm:$0xff] %v4590_v43  ;;  %v4592_v44 = vld [vmem:[#allocation2 + $0x64] ss:$8 sps:$4 sm:$0xff]   ;;  %v4600_v46 = vld [vmem:[#allocation2 + $0x60] ss:$8 sps:$4 sm:$0xff]  }
  0xa1   :  { %v4594_v45 = vld [vmem:[#allocation2 + $0xe4] ss:$8 sps:$4 sm:$0xff]   ;;  %v4602_v47 = vld [vmem:[#allocation2 + $0xe0] ss:$8 sps:$4 sm:$0xff]   ;;  %v4604_v48 = vld [vmem:[#allocation2 + $0x74] ss:$8 sps:$4 sm:$0xff]  }
  0xa2   :  { %2874 = vmatpush3.bf16.msra.mxu0 %v4490_v9  ;;  %3757 = vmatpush3.bf16.msra.mxu1 %v4490_v9  ;;  %5040 = vst [vmem:[#allocation32_spill] sm:$0xff] %v4594_v45  ;;  %5041 = vst [vmem:[#allocation33_spill] sm:$0xff] %v4602_v47  ;;  %v4606_v49 = vld [vmem:[#allocation2 + $0xf4] ss:$8 sps:$4 sm:$0xff]   ;;  %v4612_v50 = vld [vmem:[#allocation2 + $0x70] ss:$8 sps:$4 sm:$0xff]  }
  0xa3   :  { %2875 = vmatprep.subr.bf16.mxu0 %v4494_v10  ;;  %3750 = vmatprep.subr.bf16.mxu1 %v4494_v10  ;;  %5042 = vst [vmem:[#allocation34_spill] sm:$0xff] %v4606_v49  ;;  %v4614_v51 = vld [vmem:[#allocation2 + $0xf0] ss:$8 sps:$4 sm:$0xff]   ;;  %v3971_v53 = vld [vmem:[#allocation8 + $0x28] sm:$0xff]   ;;  %v3974_v10 = vld [vmem:[#allocation7] sm:$0xff]  }
  0xa4   :  { %5043 = vst [vmem:[#allocation35_spill] sm:$0xff] %v4614_v51  ;;  %v3972_v54 = vld [vmem:[#allocation8 + $0x30] sm:$0xff]   ;;  %v3973_v55 = vld [vmem:[#allocation8 + $0x38] sm:$0xff]  }
  0xa6   :  { %2876 = vmatpush3.bf16.msra.mxu0 %v4505_v13  ;;  %3758 = vmatpush3.bf16.msra.mxu1 %v4505_v13 }
  0xa7   :  { %2877 = vmatprep.subr.bf16.mxu0 %v4509_v14  ;;  %3751 = vmatprep.subr.bf16.mxu1 %v4509_v14 }
  0xaa   :  { %2878 = vmatpush3.bf16.msra.mxu0 %v4514_v15  ;;  %3759 = vmatpush3.bf16.msra.mxu1 %v4514_v15 }
  0xab   :  { %2879 = vmatprep.subr.bf16.mxu0 %v4518_v16  ;;  %3752 = vmatprep.subr.bf16.mxu1 %v4518_v16 }
  0xae   :  { %2880 = vmatpush3.bf16.msra.mxu0 %v4522_v17  ;;  %3760 = vmatpush3.bf16.msra.mxu1 %v4522_v17 }
  0xaf   :  { %3457 = vmatprep.subr.bf16.mxu0 %v3966_v25 }
  0xb1   :  { %499 = vmatmul.mubr.bf16.vlgmr.msra.gmra.mrb[0].mxu0 %v4526_v18  ;;  %563 = vmatmul.mubr.bf16.vlgmr.msra.gmra.mrb[0].mxu1 %v4528_v19 }
  0xb2   :  { %506 = vmatprep.mubr.bf16.mxu0 %v4532_v20  ;;  %570 = vmatprep.mubr.bf16.mxu1 %v4534_v21 }
  0xb3   :  { %3458 = vmatpush3.bf16.msra.mxu0 %v3966_v25 }
  0xb4   :  { %3459 = vmatprep.subr.bf16.mxu0 %v3967_v27 }
  0xb7   :  { %3460 = vmatpush3.bf16.msra.mxu0 %v3967_v27 }
  0xb8   :  { %3461 = vmatprep.subr.bf16.mxu0 %v3968_v28 }
  0xb9   :  { %507 = vmatmul.mubr.bf16.gmra.mrb[4].mxu0 %v4540_v22  ;;  %571 = vmatmul.mubr.bf16.gmra.mrb[4].mxu1 %v4542_v23 }
  0xba   :  { %514 = vmatprep.mubr.bf16.mxu0 %v4544_v24  ;;  %578 = vmatprep.mubr.bf16.mxu1 %v4546_v26 }
  0xbb   :  { %3462 = vmatpush3.bf16.msra.mxu0 %v3968_v28 }
  0xbc   :  { %3463 = vmatprep.subr.bf16.mxu0 %v3969_v33 }
  0xbf   :  { %3464 = vmatpush3.bf16.msra.mxu0 %v3969_v33 }
  0xc0   :  { %3465 = vmatprep.subr.bf16.mxu0 %v3970_v52 }
  0xc1   :  { %515 = vmatmul.mubr.bf16.gmra.mrb[8].mxu0 %v4552_v29  ;;  %579 = vmatmul.mubr.bf16.gmra.mrb[8].mxu1 %v4554_v30 }
  0xc2   :  { %522 = vmatprep.mubr.bf16.mxu0 %v4556_v31  ;;  %586 = vmatprep.mubr.bf16.mxu1 %v4558_v32 }
  0xc3   :  { %3466 = vmatpush3.bf16.msra.mxu0 %v3970_v52 }
  0xc4   :  { %3467 = vmatprep.subr.bf16.mxu0 %v3971_v53 }
  0xc7   :  { %3468 = vmatpush3.bf16.msra.mxu0 %v3971_v53 }
  0xc8   :  { %3469 = vmatprep.subr.bf16.mxu0 %v3972_v54 }
  0xc9   :  { %523 = vmatmul.mubr.bf16.gmra.mrb[12].mxu0 %v4564_v34  ;;  %587 = vmatmul.mubr.bf16.gmra.mrb[12].mxu1 %v4566_v35 }
  0xca   :  { %530 = vmatprep.mubr.bf16.mxu0 %v4568_v36  ;;  %594 = vmatprep.mubr.bf16.mxu1 %v4570_v37 }
  0xcb   :  { %3470 = vmatpush3.bf16.msra.mxu0 %v3972_v54 }
  0xcc   :  { %3471 = vmatprep.subr.bf16.mxu0 %v3973_v55 }
  0xcf   :  { %3472 = vmatpush3.bf16.msra.mxu0 %v3973_v55 }
  0xd0   :  { %3505 = vmatprep.subr.bf16.mxu0 %v3974_v10 }
  0xd1   :  { %531 = vmatmul.mubr.bf16.gmra.mrb[16].mxu0 %v4576_v38  ;;  %595 = vmatmul.mubr.bf16.gmra.mrb[16].mxu1 %v4578_v39 }
  0xd2   :  { %538 = vmatprep.mubr.bf16.mxu0 %v4580_v40  ;;  %602 = vmatprep.mubr.bf16.mxu1 %v4582_v41 }
  0xd9   :  { %539 = vmatmul.mubr.bf16.gmra.mrb[20].mxu0 %v4588_v42  ;;  %603 = vmatmul.mubr.bf16.gmra.mrb[20].mxu1 %v4590_v43 }
  0xda   :  { %546 = vmatprep.mubr.bf16.mxu0 %v4592_v44  ;;  %610 = vmatprep.mubr.bf16.mxu1 %v4594_v45 }
  0xe1   :  { %547 = vmatmul.mubr.bf16.gmra.mrb[24].mxu0 %v4600_v46  ;;  %611 = vmatmul.mubr.bf16.gmra.mrb[24].mxu1 %v4602_v47 }
  0xe2   :  { %554 = vmatprep.mubr.bf16.mxu0 %v4604_v48  ;;  %618 = vmatprep.mubr.bf16.mxu1 %v4606_v49 }
  0xe9   :  { %555 = vmatmul.mubr.bf16.gmra.mrb[28].mxu0 %v4612_v50  ;;  %619 = vmatmul.mubr.bf16.gmra.mrb[28].mxu1 %v4614_v51 }
  0xea   :  { %675 = vmatprep.mubr.bf16.mxu1 %v4498_v11 }
 0x184   :  { %v2881_v56 = vpop.f32.mrb[0].mxu0  ;;  %v2929_v57 = vpop.f32.mrb[0].mxu1 }
 0x185   :  { %v2882_v58 = vpop.f32.mrb[1].mxu0  ;;  %v2930_v59 = vpop.f32.mrb[1].mxu1 }
 0x186   :  { %v2883_v60 = vadd.f32 %v2882_v58, %v2881_v56  ;;  %v2931_v61 = vadd.f32 %v2930_v59, %v2929_v57  ;;  %v2884_v62 = vpop.f32.mrb[2].mxu0  ;;  %v2932_v63 = vpop.f32.mrb[2].mxu1 }
 0x187   :  { %v2885_v25 = vpop.f32.mrb[3].mxu0  ;;  %v2933_v27 = vpop.f32.mrb[3].mxu1 }
 0x188   :  { %v2886_v28 = vadd.f32 %v2885_v25, %v2884_v62  ;;  %v2934_v33 = vadd.f32 %v2933_v27, %v2932_v63 }
 0x18a   :  { %v627_v52 = vpack.c.bf16 %v2886_v28, %v2883_v60  ;;  %v4619_v53 = vpack.c.bf16 %v2934_v33, %v2931_v61 }
 0x18c   :  { %v2887_v11 = vpop.f32.mrb[4].mxu0  ;;  %v2935_v54 = vpop.f32.mrb[4].mxu1  ;;  %2977 = vmatprep.subr.bf16.mxu1 %v4619_v53  ;;  %3473 = vmatprep.mubr.bf16.mxu0 %v627_v52 }
 0x18d   :  { %v2888_v55 = vpop.f32.mrb[5].mxu0  ;;  %v2936_v51 = vpop.f32.mrb[5].mxu1  ;;  %2978 = vmatpush3.bf16.msra.mxu1 %v627_v52 }
 0x18e   :  { %v2889_v49 = vadd.f32 %v2888_v55, %v2887_v11  ;;  %v2937_v56 = vadd.f32 %v2936_v51, %v2935_v54  ;;  %v2890_v57 = vpop.f32.mrb[6].mxu0  ;;  %v2938_v58 = vpop.f32.mrb[6].mxu1 }
 0x18f   :  { %v2891_v59 = vpop.f32.mrb[7].mxu0  ;;  %v2939_v47 = vpop.f32.mrb[7].mxu1 }
 0x190   :  { %v2892_v45 = vadd.f32 %v2891_v59, %v2890_v57  ;;  %v2940_v62 = vadd.f32 %v2939_v47, %v2938_v58 }
 0x192   :  { %v628_v63 = vpack.c.bf16 %v2892_v45, %v2889_v49  ;;  %v4622_v60 = vpack.c.bf16 %v2940_v62, %v2937_v56 }
 0x194   :  { %v2893_v61 = vpop.f32.mrb[8].mxu0  ;;  %v2941_v25 = vpop.f32.mrb[8].mxu1  ;;  %2979 = vmatprep.subr.bf16.mxu1 %v4622_v60  ;;  %3474 = vmatmul.mubr.bf16.vlgmr.msra.gmra.mrb[32].mxu0 %v628_v63 }
 0x195   :  { %v2894_v27 = vpop.f32.mrb[9].mxu0  ;;  %v2942_v28 = vpop.f32.mrb[9].mxu1  ;;  %2980 = vmatpush3.bf16.msra.mxu1 %v628_v63  ;;  %3506 = vmatpush3.bf16.msra.mxu0 %v3974_v10  ;;  %v3979_v10 = vld [vmem:[#allocation7 + $0x28] sm:$0xff]  }
 0x196   :  { %v2895_v33 = vadd.f32 %v2894_v27, %v2893_v61  ;;  %v2943_v11 = vadd.f32 %v2942_v28, %v2941_v25  ;;  %v2896_v51 = vpop.f32.mrb[10].mxu0  ;;  %v2944_v52 = vpop.f32.mrb[10].mxu1 }
 0x197   :  { %v2897_v54 = vpop.f32.mrb[11].mxu0  ;;  %v2945_v55 = vpop.f32.mrb[11].mxu1 }
 0x198   :  { %v2898_v43 = vadd.f32 %v2897_v54, %v2896_v51  ;;  %v2946_v57 = vadd.f32 %v2945_v55, %v2944_v52 }
 0x19a   :  { %v629_v47 = vpack.c.bf16 %v2898_v43, %v2895_v33  ;;  %v4625_v45 = vpack.c.bf16 %v2946_v57, %v2943_v11 }
 0x19c   :  { %v2899_v49 = vpop.f32.mrb[12].mxu0  ;;  %v2947_v56 = vpop.f32.mrb[12].mxu1  ;;  %2981 = vmatprep.subr.bf16.mxu1 %v4625_v45  ;;  %3477 = vmatprep.mubr.bf16.mxu0 %v629_v47 }
 0x19d   :  { %v2900_v58 = vpop.f32.mrb[13].mxu0  ;;  %v2948_v59 = vpop.f32.mrb[13].mxu1  ;;  %2982 = vmatpush3.bf16.msra.mxu1 %v629_v47 }
 0x19e   :  { %v2901_v62 = vadd.f32 %v2900_v58, %v2899_v49  ;;  %v2949_v63 = vadd.f32 %v2948_v59, %v2947_v56  ;;  %v2902_v61 = vpop.f32.mrb[14].mxu0  ;;  %v2950_v25 = vpop.f32.mrb[14].mxu1 }
 0x19f   :  { %v2903_v27 = vpop.f32.mrb[15].mxu0  ;;  %v2951_v28 = vpop.f32.mrb[15].mxu1 }
 0x1a0   :  { %v2904_v41 = vadd.f32 %v2903_v27, %v2902_v61  ;;  %v2952_v51 = vadd.f32 %v2951_v28, %v2950_v25 }
 0x1a2   :  { %v630_v52 = vpack.c.bf16 %v2904_v41, %v2901_v62  ;;  %v4628_v43 = vpack.c.bf16 %v2952_v51, %v2949_v63 }
 0x1a4   :  { %v2905_v33 = vpop.f32.mrb[16].mxu0  ;;  %v2953_v11 = vpop.f32.mrb[16].mxu1  ;;  %2983 = vmatprep.subr.bf16.mxu1 %v4628_v43  ;;  %3478 = vmatmul.mubr.bf16.gmra.mrb[36].mxu0 %v630_v52 }
 0x1a5   :  { %v2906_v54 = vpop.f32.mrb[17].mxu0  ;;  %v2954_v55 = vpop.f32.mrb[17].mxu1  ;;  %2984 = vmatpush3.bf16.msra.mxu1 %v630_v52 }
 0x1a6   :  { %v2907_v57 = vadd.f32 %v2906_v54, %v2905_v33  ;;  %v2955_v47 = vadd.f32 %v2954_v55, %v2953_v11  ;;  %v2908_v49 = vpop.f32.mrb[18].mxu0  ;;  %v2956_v56 = vpop.f32.mrb[18].mxu1 }
 0x1a7   :  { %v2909_v58 = vpop.f32.mrb[19].mxu0  ;;  %v2957_v59 = vpop.f32.mrb[19].mxu1 }
 0x1a8   :  { %v2910_v39 = vadd.f32 %v2909_v58, %v2908_v49  ;;  %v2958_v61 = vadd.f32 %v2957_v59, %v2956_v56 }
 0x1aa   :  { %v631_v25 = vpack.c.bf16 %v2910_v39, %v2907_v57  ;;  %v4631_v41 = vpack.c.bf16 %v2958_v61, %v2955_v47 }
 0x1ac   :  { %v2911_v62 = vpop.f32.mrb[20].mxu0  ;;  %v2959_v63 = vpop.f32.mrb[20].mxu1  ;;  %2985 = vmatprep.subr.bf16.mxu1 %v4631_v41  ;;  %3481 = vmatprep.mubr.bf16.mxu0 %v631_v25 }
 0x1ad   :  { %v2912_v27 = vpop.f32.mrb[21].mxu0  ;;  %v2960_v28 = vpop.f32.mrb[21].mxu1  ;;  %2986 = vmatpush3.bf16.msra.mxu1 %v631_v25 }
 0x1ae   :  { %v2913_v51 = vadd.f32 %v2912_v27, %v2911_v62  ;;  %v2961_v52 = vadd.f32 %v2960_v28, %v2959_v63  ;;  %v2914_v33 = vpop.f32.mrb[22].mxu0  ;;  %v2962_v11 = vpop.f32.mrb[22].mxu1 }
 0x1af   :  { %v2915_v54 = vpop.f32.mrb[23].mxu0  ;;  %v2963_v55 = vpop.f32.mrb[23].mxu1 }
 0x1b0   :  { %v2916_v16 = vadd.f32 %v2915_v54, %v2914_v33  ;;  %v2964_v49 = vadd.f32 %v2963_v55, %v2962_v11 }
 0x1b2   :  { %v632_v56 = vpack.c.bf16 %v2916_v16, %v2913_v51  ;;  %v4634_v39 = vpack.c.bf16 %v2964_v49, %v2961_v52 }
 0x1b4   :  { %v2917_v57 = vpop.f32.mrb[24].mxu0  ;;  %v2965_v47 = vpop.f32.mrb[24].mxu1  ;;  %2987 = vmatprep.subr.bf16.mxu1 %v4634_v39  ;;  %3482 = vmatmul.mubr.bf16.gmra.mrb[40].mxu0 %v632_v56 }
 0x1b5   :  { %v2918_v58 = vpop.f32.mrb[25].mxu0  ;;  %v2966_v59 = vpop.f32.mrb[25].mxu1  ;;  %2988 = vmatpush3.bf16.msra.mxu1 %v632_v56 }
 0x1b6   :  { %v2919_v61 = vadd.f32 %v2918_v58, %v2917_v57  ;;  %v2967_v25 = vadd.f32 %v2966_v59, %v2965_v47  ;;  %v2920_v62 = vpop.f32.mrb[26].mxu0  ;;  %v2968_v63 = vpop.f32.mrb[26].mxu1 }
 0x1b7   :  { %v2921_v27 = vpop.f32.mrb[27].mxu0  ;;  %v2969_v28 = vpop.f32.mrb[27].mxu1 }
 0x1b8   :  { %v2922_v37 = vadd.f32 %v2921_v27, %v2920_v62  ;;  %v2970_v33 = vadd.f32 %v2969_v28, %v2968_v63 }
 0x1ba   :  { %v633_v11 = vpack.c.bf16 %v2922_v37, %v2919_v61  ;;  %v641_v16 = vpack.c.bf16 %v2970_v33, %v2967_v25  ;;  %v3975_v37 = vld [vmem:[#allocation7 + $0x8] sm:$0xff]   ;;  %v3976_v61 = vld [vmem:[#allocation7 + $0x10] sm:$0xff]   ;;  %v3977_v25 = vld [vmem:[#allocation7 + $0x18] sm:$0xff]  }
 0x1bb   :  { %3507 = vmatprep.subr.bf16.mxu0 %v3975_v37 }
 0x1bc   :  { %v2923_v51 = vpop.f32.mrb[28].mxu0  ;;  %v2971_v52 = vpop.f32.mrb[28].mxu1  ;;  %2989 = vmatprep.subr.bf16.mxu1 %v641_v16  ;;  %3485 = vmatprep.mubr.bf16.mxu0 %v633_v11 }
 0x1bd   :  { %v2924_v54 = vpop.f32.mrb[29].mxu0  ;;  %v2972_v55 = vpop.f32.mrb[29].mxu1  ;;  %2990 = vmatpush3.bf16.msra.mxu1 %v633_v11  ;;  %3508 = vmatpush3.bf16.msra.mxu0 %v3975_v37 }
 0x1be   :  { %v2925_v49 = vadd.f32 %v2924_v54, %v2923_v51  ;;  %v2973_v35 = vadd.f32 %v2972_v55, %v2971_v52  ;;  %v2926_v56 = vpop.f32.mrb[30].mxu0  ;;  %v2974_v57 = vpop.f32.mrb[30].mxu1  ;;  %3509 = vmatprep.subr.bf16.mxu0 %v3976_v61 }
 0x1bf   :  { %v2927_v47 = vpop.f32.mrb[31].mxu0  ;;  %v2975_v58 = vpop.f32.mrb[31].mxu1 }
 0x1c0   :  { %v2928_v59 = vadd.f32 %v2927_v47, %v2926_v56  ;;  %v2976_v14 = vadd.f32 %v2975_v58, %v2974_v57 }
 0x1c1   :  { %3510 = vmatpush3.bf16.msra.mxu0 %v3976_v61 }
 0x1c2   :  { %v634_v62 = vpack.c.bf16 %v2928_v59, %v2925_v49  ;;  %v642_v63 = vpack.c.bf16 %v2976_v14, %v2973_v35  ;;  %3511 = vmatprep.subr.bf16.mxu0 %v3977_v25  ;;  %v3978_v14 = vld [vmem:[#allocation7 + $0x20] sm:$0xff]  }
 0x1c4   :  { %2991 = vmatprep.subr.bf16.mxu1 %v642_v63  ;;  %3486 = vmatmul.mubr.bf16.gmra.mrb[44].mxu0 %v634_v62 }
 0x1c5   :  { %2992 = vmatpush3.bf16.msra.mxu1 %v634_v62  ;;  %3489 = vmatprep.mubr.bf16.mxu0 %v4619_v53 }
 0x1c6   :  { %3512 = vmatpush3.bf16.msra.mxu0 %v3977_v25 }
 0x1c7   :  { %3513 = vmatprep.subr.bf16.mxu0 %v3978_v14 }
 0x1c8   :  { %676 = vmatmul.mubr.bf16.vlgmr.msra.gmra.mrb[32].mxu1 %v4526_v18  ;;  %v3980_v18 = vld [vmem:[#allocation7 + $0x30] sm:$0xff]  }
 0x1c9   :  { %683 = vmatprep.mubr.bf16.mxu1 %v4532_v20  ;;  %v3981_v20 = vld [vmem:[#allocation7 + $0x38] sm:$0xff]  }
 0x1ca   :  { %3514 = vmatpush3.bf16.msra.mxu0 %v3978_v14 }
 0x1cb   :  { %3515 = vmatprep.subr.bf16.mxu0 %v3979_v10 }
 0x1cc   :  { %3490 = vmatmul.mubr.bf16.gmra.mrb[48].mxu0 %v4622_v60 }
 0x1cd   :  { %3493 = vmatprep.mubr.bf16.mxu0 %v4625_v45 }
 0x1ce   :  { %3516 = vmatpush3.bf16.msra.mxu0 %v3979_v10 }
 0x1cf   :  { %3517 = vmatprep.subr.bf16.mxu0 %v3980_v18 }
 0x1d0   :  { %684 = vmatmul.mubr.bf16.gmra.mrb[36].mxu1 %v4540_v22  ;;  %v3982_v22 = vld [vmem:[#allocation10] sm:$0xff]  }
 0x1d1   :  { %691 = vmatprep.mubr.bf16.mxu1 %v4544_v24  ;;  %v3983_v24 = vld [vmem:[#allocation10 + $0x8] sm:$0xff]  }
 0x1d2   :  { %3518 = vmatpush3.bf16.msra.mxu0 %v3980_v18 }
 0x1d3   :  { %3519 = vmatprep.subr.bf16.mxu0 %v3981_v20 }
 0x1d4   :  { %3494 = vmatmul.mubr.bf16.gmra.mrb[52].mxu0 %v4628_v43 }
 0x1d5   :  { %3497 = vmatprep.mubr.bf16.mxu0 %v4631_v41 }
 0x1d6   :  { %3520 = vmatpush3.bf16.msra.mxu0 %v3981_v20 }
 0x1d7   :  { %3553 = vmatprep.subr.bf16.mxu0 %v3982_v22 }
 0x1d8   :  { %692 = vmatmul.mubr.bf16.gmra.mrb[40].mxu1 %v4552_v29  ;;  %v3984_v29 = vld [vmem:[#allocation10 + $0x10] sm:$0xff]  }
 0x1d9   :  { %699 = vmatprep.mubr.bf16.mxu1 %v4556_v31  ;;  %v3985_v31 = vld [vmem:[#allocation10 + $0x18] sm:$0xff]  }
 0x1dc   :  { %3498 = vmatmul.mubr.bf16.gmra.mrb[56].mxu0 %v4634_v39 }
 0x1dd   :  { %3501 = vmatprep.mubr.bf16.mxu0 %v641_v16 }
 0x1e0   :  { %700 = vmatmul.mubr.bf16.gmra.mrb[44].mxu1 %v4564_v34 }
 0x1e1   :  { %707 = vmatprep.mubr.bf16.mxu1 %v4568_v36 }
 0x1e4   :  { %3502 = vmatmul.mubr.bf16.gmra.mrb[60].mxu0 %v642_v63 }
 0x1e5   :  { %3521 = vmatprep.mubr.bf16.mxu0 %v4460_v1  ;;  %v5044_v1 = vld [vmem:[#allocation23_spill] sm:$0xff] }
 0x1e8   :  { %708 = vmatmul.mubr.bf16.gmra.mrb[48].mxu1 %v4576_v38 }
 0x1e9   :  { %715 = vmatprep.mubr.bf16.mxu1 %v4580_v40 }
 0x1ec   :  { %3522 = vmatmul.mubr.bf16.vlgmr.msra.gmra.mrb[32].mxu0 %v4468_v3  ;;  %v5045_v3 = vld [vmem:[#allocation25_spill] sm:$0xff] }
 0x1ed   :  { %3525 = vmatprep.mubr.bf16.mxu0 %v4476_v5  ;;  %3554 = vmatpush3.bf16.msra.mxu0 %v3982_v22  ;;  %v5047_v5 = vld [vmem:[#allocation28_spill] sm:$0xff] }
 0x1ee   :  { %3555 = vmatprep.subr.bf16.mxu0 %v3983_v24 }
 0x1f0   :  { %716 = vmatmul.mubr.bf16.gmra.mrb[52].mxu1 %v4588_v42 }
 0x1f1   :  { %723 = vmatprep.mubr.bf16.mxu1 %v4592_v44  ;;  %3556 = vmatpush3.bf16.msra.mxu0 %v3983_v24 }
 0x1f2   :  { %3557 = vmatprep.subr.bf16.mxu0 %v3984_v29 }
 0x1f4   :  { %3526 = vmatmul.mubr.bf16.gmra.mrb[36].mxu0 %v4484_v7  ;;  %v5048_v7 = vld [vmem:[#allocation26_spill] sm:$0xff] }
 0x1f5   :  { %3529 = vmatprep.mubr.bf16.mxu0 %v4490_v9  ;;  %3558 = vmatpush3.bf16.msra.mxu0 %v3984_v29  ;;  %v5049_v9 = vld [vmem:[#allocation29_spill] sm:$0xff] }
 0x1f6   :  { %3559 = vmatprep.subr.bf16.mxu0 %v3985_v31 }
 0x1f8   :  { %724 = vmatmul.mubr.bf16.gmra.mrb[56].mxu1 %v4600_v46 }
 0x1f9   :  { %731 = vmatprep.mubr.bf16.mxu1 %v4604_v48  ;;  %3560 = vmatpush3.bf16.msra.mxu0 %v3985_v31 }
 0x1fc   :  { %3530 = vmatmul.mubr.bf16.gmra.mrb[40].mxu0 %v4505_v13  ;;  %v5051_v13 = vld [vmem:[#allocation31_spill] sm:$0xff] }
 0x1fd   :  { %3533 = vmatprep.mubr.bf16.mxu0 %v4514_v15  ;;  %v5052_v15 = vld [vmem:[#allocation32_spill] sm:$0xff] }
 0x200   :  { %732 = vmatmul.mubr.bf16.gmra.mrb[60].mxu1 %v4612_v50 }
 0x201   :  { %739 = vmatprep.mubr.bf16.mxu1 %v4500_v12  ;;  %v5050_v12 = vld [vmem:[#allocation30_spill] sm:$0xff] }
 0x204   :  { %3534 = vmatmul.mubr.bf16.gmra.mrb[44].mxu0 %v4522_v17  ;;  %v5053_v17 = vld [vmem:[#allocation33_spill] sm:$0xff] }
 0x205   :  { %3537 = vmatprep.mubr.bf16.mxu0 %v4458_v0  ;;  %v3986_v0 = vld [vmem:[#allocation10 + $0x20] sm:$0xff]  }
 0x206   :  { %3561 = vmatprep.subr.bf16.mxu0 %v3986_v0 }
 0x207   :  { %3562 = vmatpush3.bf16.msra.mxu0 %v3986_v0 }
 0x208   :  { %740 = vmatmul.mubr.bf16.gmra.mrb[64].mxu1 %v4528_v19  ;;  %v5054_v19 = vld [vmem:[#allocation34_spill] sm:$0xff] }
 0x209   :  { %747 = vmatprep.mubr.bf16.mxu1 %v4534_v21  ;;  %v5055_v21 = vld [vmem:[#allocation35_spill] sm:$0xff] }
 0x20c   :  { %3538 = vmatmul.mubr.bf16.gmra.mrb[48].mxu0 %v4464_v2  ;;  %v3987_v2 = vld [vmem:[#allocation10 + $0x28] sm:$0xff]  }
 0x20d   :  { %3541 = vmatprep.mubr.bf16.mxu0 %v4472_v4  ;;  %3563 = vmatprep.subr.bf16.mxu0 %v3987_v2  ;;  %v5046_v4 = vld [vmem:[#allocation27_spill] sm:$0xff] }
 0x20e   :  { %3564 = vmatpush3.bf16.msra.mxu0 %v3987_v2 }
 0x210   :  { %748 = vmatmul.mubr.bf16.gmra.mrb[68].mxu1 %v4542_v23  ;;  %v5056_v23 = vld [vmem:[#allocation24_spill] sm:$0xff] }
 0x211   :  { %755 = vmatprep.mubr.bf16.mxu1 %v4546_v26 }
 0x214   :  { %3542 = vmatmul.mubr.bf16.gmra.mrb[52].mxu0 %v4480_v6  ;;  %v3988_v6 = vld [vmem:[#allocation10 + $0x30] sm:$0xff]  }
 0x215   :  { %3545 = vmatprep.mubr.bf16.mxu0 %v4488_v8  ;;  %3565 = vmatprep.subr.bf16.mxu0 %v3988_v6  ;;  %v3989_v8 = vld [vmem:[#allocation10 + $0x38] sm:$0xff]  }
 0x216   :  { %3566 = vmatpush3.bf16.msra.mxu0 %v3988_v6 }
 0x217   :  { %3567 = vmatprep.subr.bf16.mxu0 %v3989_v8 }
 0x218   :  { %756 = vmatmul.mubr.bf16.gmra.mrb[72].mxu1 %v4554_v30 }
 0x219   :  { %763 = vmatprep.mubr.bf16.mxu1 %v4558_v32 }
 0x21a   :  { %3568 = vmatpush3.bf16.msra.mxu0 %v3989_v8 }
 0x21c   :  { %3546 = vmatmul.mubr.bf16.gmra.mrb[56].mxu0 %v5044_v1 }
 0x21d   :  { %3549 = vmatprep.mubr.bf16.mxu0 %v5045_v3 }
 0x220   :  { %764 = vmatmul.mubr.bf16.gmra.mrb[76].mxu1 %v5046_v4 }
 0x221   :  { %771 = vmatprep.mubr.bf16.mxu1 %v5047_v5 }
 0x224   :  { %3550 = vmatmul.mubr.bf16.gmra.mrb[60].mxu0 %v5048_v7 }
 0x228   :  { %772 = vmatmul.mubr.bf16.gmra.mrb[80].mxu1 %v5049_v9 }
 0x229   :  { %779 = vmatprep.mubr.bf16.mxu1 %v5050_v12 }
 0x230   :  { %780 = vmatmul.mubr.bf16.gmra.mrb[84].mxu1 %v5051_v13 }
 0x231   :  { %787 = vmatprep.mubr.bf16.mxu1 %v5052_v15 }
 0x238   :  { %788 = vmatmul.mubr.bf16.gmra.mrb[88].mxu1 %v5053_v17 }
 0x239   :  { %795 = vmatprep.mubr.bf16.mxu1 %v5054_v19 }
 0x240   :  { %796 = vmatmul.mubr.bf16.gmra.mrb[92].mxu1 %v5055_v21 }
 0x241   :  { %1646 = vmatprep.mubr.bf16.mxu1 %v5056_v23 }
 0x29b   :  { %v2993_v26 = vpop.f32.mrb[32].mxu1 }
 0x29c   :  { %v2994_v30 = vpop.f32.mrb[33].mxu1 }
 0x29d   :  { %v2995_v32 = vadd.f32 %v2994_v30, %v2993_v26  ;;  %v2996_v34 = vpop.f32.mrb[34].mxu1 }
 0x29e   :  { %v2997_v35 = vpop.f32.mrb[35].mxu1 }
 0x29f   :  { %v2998_v36 = vadd.f32 %v2997_v35, %v2996_v34 }
 0x2a1   :  { %v804_v38 = vpack.c.bf16 %v2998_v36, %v2995_v32 }
 0x2a3   :  { %v2999_v40 = vpop.f32.mrb[36].mxu1  ;;  %3569 = vmatprep.mubr.bf16.mxu0 %v804_v38 }
 0x2a4   :  { %v3000_v42 = vpop.f32.mrb[37].mxu1 }
 0x2a5   :  { %v3001_v44 = vadd.f32 %v3000_v42, %v2999_v40  ;;  %v3002_v46 = vpop.f32.mrb[38].mxu1 }
 0x2a6   :  { %v3003_v48 = vpop.f32.mrb[39].mxu1 }
 0x2a7   :  { %v3004_v50 = vadd.f32 %v3003_v48, %v3002_v46 }
 0x2a9   :  { %v805_v53 = vpack.c.bf16 %v3004_v50, %v3001_v44 }
 0x2ab   :  { %v3005_v60 = vpop.f32.mrb[40].mxu1  ;;  %3570 = vmatmul.mubr.bf16.vlgmr.msra.gmra.mrb[32].mxu0 %v805_v53 }
 0x2ac   :  { %v3006_v45 = vpop.f32.mrb[41].mxu1 }
 0x2ad   :  { %v3007_v43 = vadd.f32 %v3006_v45, %v3005_v60  ;;  %v3008_v41 = vpop.f32.mrb[42].mxu1 }
 0x2ae   :  { %v3009_v39 = vpop.f32.mrb[43].mxu1 }
 0x2af   :  { %v3010_v27 = vadd.f32 %v3009_v39, %v3008_v41 }
 0x2b1   :  { %v806_v28 = vpack.c.bf16 %v3010_v27, %v3007_v43 }
 0x2b3   :  { %v3011_v33 = vpop.f32.mrb[44].mxu1  ;;  %3573 = vmatprep.mubr.bf16.mxu0 %v806_v28 }
 0x2b4   :  { %v3012_v11 = vpop.f32.mrb[45].mxu1 }
 0x2b5   :  { %v3013_v16 = vadd.f32 %v3012_v11, %v3011_v33  ;;  %v3014_v51 = vpop.f32.mrb[46].mxu1 }
 0x2b6   :  { %v3015_v52 = vpop.f32.mrb[47].mxu1 }
 0x2b7   :  { %v3016_v54 = vadd.f32 %v3015_v52, %v3014_v51 }
 0x2b9   :  { %v807_v55 = vpack.c.bf16 %v3016_v54, %v3013_v16 }
 0x2bb   :  { %v3017_v49 = vpop.f32.mrb[48].mxu1  ;;  %3574 = vmatmul.mubr.bf16.gmra.mrb[36].mxu0 %v807_v55 }
 0x2bc   :  { %v3018_v56 = vpop.f32.mrb[49].mxu1 }
 0x2bd   :  { %v3019_v57 = vadd.f32 %v3018_v56, %v3017_v49  ;;  %v3020_v47 = vpop.f32.mrb[50].mxu1 }
 0x2be   :  { %v3021_v58 = vpop.f32.mrb[51].mxu1 }
 0x2bf   :  { %v3022_v59 = vadd.f32 %v3021_v58, %v3020_v47 }
 0x2c1   :  { %v808_v62 = vpack.c.bf16 %v3022_v59, %v3019_v57 }
 0x2c3   :  { %v3023_v63 = vpop.f32.mrb[52].mxu1  ;;  %3577 = vmatprep.mubr.bf16.mxu0 %v808_v62 }
 0x2c4   :  { %v3024_v37 = vpop.f32.mrb[53].mxu1 }
 0x2c5   :  { %v3025_v61 = vadd.f32 %v3024_v37, %v3023_v63  ;;  %v3026_v25 = vpop.f32.mrb[54].mxu1 }
 0x2c6   :  { %v3027_v14 = vpop.f32.mrb[55].mxu1 }
 0x2c7   :  { %v3028_v10 = vadd.f32 %v3027_v14, %v3026_v25 }
 0x2c9   :  { %v809_v18 = vpack.c.bf16 %v3028_v10, %v3025_v61 }
 0x2cb   :  { %v3029_v20 = vpop.f32.mrb[56].mxu1  ;;  %3578 = vmatmul.mubr.bf16.gmra.mrb[40].mxu0 %v809_v18 }
 0x2cc   :  { %v3030_v22 = vpop.f32.mrb[57].mxu1 }
 0x2cd   :  { %v3031_v24 = vadd.f32 %v3030_v22, %v3029_v20  ;;  %v3032_v29 = vpop.f32.mrb[58].mxu1 }
 0x2ce   :  { %v3033_v31 = vpop.f32.mrb[59].mxu1 }
 0x2cf   :  { %v3034_v0 = vadd.f32 %v3033_v31, %v3032_v29 }
 0x2d1   :  { %v810_v1 = vpack.c.bf16 %v3034_v0, %v3031_v24 }
 0x2d3   :  { %v3035_v2 = vpop.f32.mrb[60].mxu1  ;;  %3581 = vmatprep.mubr.bf16.mxu0 %v810_v1  ;;  %v4694_v1 = vld [vmem:[%s5005_s5] ss:$0 sm:$0xff] }
 0x2d4   :  { %v3036_v3 = vpop.f32.mrb[61].mxu1 }
 0x2d5   :  { %v3037_v4 = vadd.f32 %v3036_v3, %v3035_v2  ;;  %v3038_v5 = vpop.f32.mrb[62].mxu1 }
 0x2d6   :  { %v3039_v6 = vpop.f32.mrb[63].mxu1 }
 0x2d7   :  { %v3040_v7 = vadd.f32 %v3039_v6, %v3038_v5 }
 0x2d9   :  { %v811_v8 = vpack.c.bf16 %v3040_v7, %v3037_v4 }
 0x2db   :  { %v3041_v9 = vpop.f32.mrb[64].mxu1  ;;  %3582 = vmatmul.mubr.bf16.gmra.mrb[44].mxu0 %v811_v8 }
 0x2dc   :  { %v3042_v12 = vpop.f32.mrb[65].mxu1 }
 0x2dd   :  { %v3043_v13 = vadd.f32 %v3042_v12, %v3041_v9  ;;  %v3044_v15 = vpop.f32.mrb[66].mxu1 }
 0x2de   :  { %v3045_v17 = vpop.f32.mrb[67].mxu1 }
 0x2df   :  { %v3046_v19 = vadd.f32 %v3045_v17, %v3044_v15 }
 0x2e1   :  { %v812_v21 = vpack.c.bf16 %v3046_v19, %v3043_v13 }
 0x2e3   :  { %v3047_v23 = vpop.f32.mrb[68].mxu1  ;;  %3585 = vmatprep.mubr.bf16.mxu0 %v812_v21 }
 0x2e4   :  { %v3048_v26 = vpop.f32.mrb[69].mxu1 }
 0x2e5   :  { %v3049_v30 = vadd.f32 %v3048_v26, %v3047_v23  ;;  %v3050_v32 = vpop.f32.mrb[70].mxu1 }
 0x2e6   :  { %v3051_v34 = vpop.f32.mrb[71].mxu1 }
 0x2e7   :  { %v3052_v35 = vadd.f32 %v3051_v34, %v3050_v32 }
 0x2e9   :  { %v813_v36 = vpack.c.bf16 %v3052_v35, %v3049_v30 }
 0x2eb   :  { %3586 = vmatmul.mubr.bf16.gmra.mrb[48].mxu0 %v813_v36  ;;  %v3053_v38 = vpop.f32.mrb[72].mxu1 }
 0x2ec   :  { %v3054_v40 = vpop.f32.mrb[73].mxu1 }
 0x2ed   :  { %v3055_v42 = vadd.f32 %v3054_v40, %v3053_v38  ;;  %v3056_v44 = vpop.f32.mrb[74].mxu1 }
 0x2ee   :  { %v3057_v46 = vpop.f32.mrb[75].mxu1 }
 0x2ef   :  { %v3058_v48 = vadd.f32 %v3057_v46, %v3056_v44 }
 0x2f1   :  { %v814_v50 = vpack.c.bf16 %v3058_v48, %v3055_v42 }
 0x2f3   :  { %v3059_v53 = vpop.f32.mrb[76].mxu1  ;;  %3589 = vmatprep.mubr.bf16.mxu0 %v814_v50 }
 0x2f4   :  { %v3060_v60 = vpop.f32.mrb[77].mxu1 }
 0x2f5   :  { %v3061_v45 = vadd.f32 %v3060_v60, %v3059_v53  ;;  %v3062_v43 = vpop.f32.mrb[78].mxu1 }
 0x2f6   :  { %v3063_v41 = vpop.f32.mrb[79].mxu1 }
 0x2f7   :  { %v3064_v39 = vadd.f32 %v3063_v41, %v3062_v43 }
 0x2f9   :  { %v815_v27 = vpack.c.bf16 %v3064_v39, %v3061_v45 }
 0x2fb   :  { %3590 = vmatmul.mubr.bf16.gmra.mrb[52].mxu0 %v815_v27  ;;  %v3065_v28 = vpop.f32.mrb[80].mxu1 }
 0x2fc   :  { %v3066_v33 = vpop.f32.mrb[81].mxu1 }
 0x2fd   :  { %v3067_v11 = vadd.f32 %v3066_v33, %v3065_v28  ;;  %v3068_v16 = vpop.f32.mrb[82].mxu1 }
 0x2fe   :  { %v3069_v51 = vpop.f32.mrb[83].mxu1 }
 0x2ff   :  { %v3070_v52 = vadd.f32 %v3069_v51, %v3068_v16 }
 0x301   :  { %v816_v54 = vpack.c.bf16 %v3070_v52, %v3067_v11 }
 0x303   :  { %v3071_v55 = vpop.f32.mrb[84].mxu1  ;;  %3593 = vmatprep.mubr.bf16.mxu0 %v816_v54 }
 0x304   :  { %v3072_v49 = vpop.f32.mrb[85].mxu1 }
 0x305   :  { %v3073_v56 = vadd.f32 %v3072_v49, %v3071_v55  ;;  %v3074_v57 = vpop.f32.mrb[86].mxu1 }
 0x306   :  { %v3075_v47 = vpop.f32.mrb[87].mxu1 }
 0x307   :  { %v3076_v58 = vadd.f32 %v3075_v47, %v3074_v57 }
 0x309   :  { %v817_v59 = vpack.c.bf16 %v3076_v58, %v3073_v56 }
 0x30b   :  { %3594 = vmatmul.mubr.bf16.gmra.mrb[56].mxu0 %v817_v59  ;;  %v3077_v62 = vpop.f32.mrb[88].mxu1 }
 0x30c   :  { %v3078_v63 = vpop.f32.mrb[89].mxu1 }
 0x30d   :  { %v3079_v37 = vadd.f32 %v3078_v63, %v3077_v62  ;;  %v3080_v61 = vpop.f32.mrb[90].mxu1 }
 0x30e   :  { %v3081_v25 = vpop.f32.mrb[91].mxu1 }
 0x30f   :  { %v3082_v14 = vadd.f32 %v3081_v25, %v3080_v61 }
 0x311   :  { %v818_v10 = vpack.c.bf16 %v3082_v14, %v3079_v37 }
 0x313   :  { %v3083_v18 = vpop.f32.mrb[92].mxu1  ;;  %3597 = vmatprep.mubr.bf16.mxu0 %v818_v10 }
 0x314   :  { %v3084_v20 = vpop.f32.mrb[93].mxu1 }
 0x315   :  { %v3085_v22 = vadd.f32 %v3084_v20, %v3083_v18  ;;  %v3086_v24 = vpop.f32.mrb[94].mxu1 }
 0x316   :  { %v3087_v29 = vpop.f32.mrb[95].mxu1 }
 0x317   :  { %v3088_v31 = vadd.f32 %v3087_v29, %v3086_v24 }
 0x319   :  { %v819_v0 = vpack.c.bf16 %v3088_v31, %v3085_v22 }
 0x31b   :  { %3598 = vmatmul.mubr.bf16.gmra.mrb[60].mxu0 %v819_v0 }
 0x37e   :  { %v3571_v2 = vpop.f32.mrb[32].mxu0 }
 0x37f   :  { %v1536_v3 = vadd.f32 %v3571_v2, %v4694_v1  ;;  %v1368_v4 = vpop.f32.mrb[33].mxu0 }
 0x380   :  { %v1534_v5 = vadd.f32 %v4694_v1, %v1368_v4  ;;  %v3572_v6 = vpop.f32.mrb[34].mxu0 }
 0x381   :  { %v1537_v7 = vadd.f32 %v3572_v6, %v4694_v1  ;;  %v1371_v8 = vpop.f32.mrb[35].mxu0  ;;  %v1568_v12 = vmax.f32 %v1536_v3, 0.0 }
 0x382   :  { %v1535_v9 = vadd.f32 %v4694_v1, %v1371_v8  ;;  %v1566_v15 = vmax.f32 %v1534_v5, 0.0 }
 0x383   :  { %v1569_v13 = vmax.f32 %v1537_v7, 0.0 }
 0x384   :  { %v1567_v17 = vmax.f32 %v1535_v9, 0.0 }
 0x385   :  { %v4700_v19 = vpack.c.bf16 %v1569_v13, %v1568_v12 }
 0x386   :  { %v4702_v21 = vpack.c.bf16 %v1567_v17, %v1566_v15 }
 0x38e   :  { %v3575_v23 = vpop.f32.mrb[36].mxu0 }
 0x38f   :  { %v1540_v26 = vadd.f32 %v3575_v23, %v4694_v1  ;;  %v1384_v30 = vpop.f32.mrb[37].mxu0 }
 0x390   :  { %v1538_v32 = vadd.f32 %v4694_v1, %v1384_v30  ;;  %v3576_v34 = vpop.f32.mrb[38].mxu0 }
 0x391   :  { %v1541_v35 = vadd.f32 %v3576_v34, %v4694_v1  ;;  %v1387_v36 = vpop.f32.mrb[39].mxu0  ;;  %v1572_v40 = vmax.f32 %v1540_v26, 0.0 }
 0x392   :  { %v1539_v38 = vadd.f32 %v4694_v1, %v1387_v36  ;;  %v1570_v44 = vmax.f32 %v1538_v32, 0.0 }
 0x393   :  { %v1573_v42 = vmax.f32 %v1541_v35, 0.0 }
 0x394   :  { %v1571_v46 = vmax.f32 %v1539_v38, 0.0 }
 0x395   :  { %v4708_v48 = vpack.c.bf16 %v1573_v42, %v1572_v40 }
 0x396   :  { %v4710_v50 = vpack.c.bf16 %v1571_v46, %v1570_v44 }
 0x39e   :  { %v3579_v53 = vpop.f32.mrb[40].mxu0 }
 0x39f   :  { %v1544_v60 = vadd.f32 %v3579_v53, %v4694_v1  ;;  %v1400_v45 = vpop.f32.mrb[41].mxu0 }
 0x3a0   :  { %v1542_v43 = vadd.f32 %v4694_v1, %v1400_v45  ;;  %v3580_v41 = vpop.f32.mrb[42].mxu0 }
 0x3a1   :  { %v1545_v39 = vadd.f32 %v3580_v41, %v4694_v1  ;;  %v1403_v27 = vpop.f32.mrb[43].mxu0  ;;  %v1576_v33 = vmax.f32 %v1544_v60, 0.0 }
 0x3a2   :  { %v1543_v28 = vadd.f32 %v4694_v1, %v1403_v27  ;;  %v1574_v16 = vmax.f32 %v1542_v43, 0.0 }
 0x3a3   :  { %v1577_v11 = vmax.f32 %v1545_v39, 0.0 }
 0x3a4   :  { %v1575_v51 = vmax.f32 %v1543_v28, 0.0 }
 0x3a5   :  { %v4716_v52 = vpack.c.bf16 %v1577_v11, %v1576_v33 }
 0x3a6   :  { %v4718_v54 = vpack.c.bf16 %v1575_v51, %v1574_v16 }
 0x3ae   :  { %v3583_v55 = vpop.f32.mrb[44].mxu0 }
 0x3af   :  { %v1548_v49 = vadd.f32 %v3583_v55, %v4694_v1  ;;  %v1416_v56 = vpop.f32.mrb[45].mxu0 }
 0x3b0   :  { %v1546_v57 = vadd.f32 %v4694_v1, %v1416_v56  ;;  %v3584_v47 = vpop.f32.mrb[46].mxu0 }
 0x3b1   :  { %v1549_v58 = vadd.f32 %v3584_v47, %v4694_v1  ;;  %v1419_v59 = vpop.f32.mrb[47].mxu0  ;;  %v1580_v63 = vmax.f32 %v1548_v49, 0.0 }
 0x3b2   :  { %v1547_v62 = vadd.f32 %v4694_v1, %v1419_v59  ;;  %v1578_v61 = vmax.f32 %v1546_v57, 0.0 }
 0x3b3   :  { %v1581_v37 = vmax.f32 %v1549_v58, 0.0 }
 0x3b4   :  { %v1579_v25 = vmax.f32 %v1547_v62, 0.0 }
 0x3b5   :  { %v4724_v14 = vpack.c.bf16 %v1581_v37, %v1580_v63 }
 0x3b6   :  { %v4726_v10 = vpack.c.bf16 %v1579_v25, %v1578_v61 }
 0x3be   :  { %v3587_v18 = vpop.f32.mrb[48].mxu0 }
 0x3bf   :  { %v1552_v20 = vadd.f32 %v3587_v18, %v4694_v1  ;;  %v1432_v22 = vpop.f32.mrb[49].mxu0 }
 0x3c0   :  { %v1550_v24 = vadd.f32 %v4694_v1, %v1432_v22  ;;  %v3588_v29 = vpop.f32.mrb[50].mxu0  ;;  %v3991_v22 = vld [vmem:[#allocation13 + $0x8] sm:$0xff]  }
 0x3c1   :  { %v1553_v31 = vadd.f32 %v3588_v29, %v4694_v1  ;;  %v1435_v0 = vpop.f32.mrb[51].mxu0  ;;  %v1584_v3 = vmax.f32 %v1552_v20, 0.0  ;;  %v3990_v20 = vld [vmem:[#allocation13] sm:$0xff]   ;;  %v3993_v29 = vld [vmem:[#allocation13 + $0x18] sm:$0xff]  }
 0x3c2   :  { %v1551_v2 = vadd.f32 %v4694_v1, %v1435_v0  ;;  %v1582_v5 = vmax.f32 %v1550_v24, 0.0  ;;  %3601 = vmatprep.subr.bf16.mxu0 %v3990_v20  ;;  %v4776_v24 = vld [vmem:[#allocation2] ss:$8 sps:$4 sm:$0xff]   ;;  %v4782_v0 = vld [vmem:[#allocation2 + $0x10] ss:$8 sps:$4 sm:$0xff]  }
 0x3c3   :  { %v1585_v4 = vmax.f32 %v1553_v31, 0.0  ;;  %3602 = vmatpush3.bf16.msra.mxu0 %v3990_v20  ;;  %v4779_v31 = vld [vmem:[#allocation2 + $0x14] ss:$8 sps:$4 sm:$0xff]  }
 0x3c4   :  { %v1583_v6 = vmax.f32 %v1551_v2, 0.0  ;;  %3603 = vmatprep.subr.bf16.mxu0 %v3991_v22  ;;  %v4785_v2 = vld [vmem:[#allocation2 + $0x24] ss:$8 sps:$4 sm:$0xff]  }
 0x3c5   :  { %v4732_v7 = vpack.c.bf16 %v1585_v4, %v1584_v3  ;;  %v4788_v3 = vld [vmem:[#allocation2 + $0x20] ss:$8 sps:$4 sm:$0xff]   ;;  %v4791_v4 = vld [vmem:[#allocation2 + $0x34] ss:$8 sps:$4 sm:$0xff]  }
 0x3c6   :  { %v4734_v8 = vpack.c.bf16 %v1583_v6, %v1582_v5  ;;  %v4794_v5 = vld [vmem:[#allocation2 + $0x30] ss:$8 sps:$4 sm:$0xff]   ;;  %v4797_v6 = vld [vmem:[#allocation2 + $0x44] ss:$8 sps:$4 sm:$0xff]  }
 0x3c7   :  { %3604 = vmatpush3.bf16.msra.mxu0 %v3991_v22 }
 0x3c8   :  { %3161 = vmatprep.subr.bf16.mxu1 %v4734_v8 }
 0x3c9   :  { %3162 = vmatpush3.bf16.msra.mxu1 %v4702_v21 }
 0x3ca   :  { %3163 = vmatprep.subr.bf16.mxu1 %v4732_v7 }
 0x3cd   :  { %3164 = vmatpush3.bf16.msra.mxu1 %v4700_v19 }
 0x3ce   :  { %v3591_v9 = vpop.f32.mrb[52].mxu0 }
 0x3cf   :  { %v1556_v12 = vadd.f32 %v3591_v9, %v4694_v1  ;;  %v1448_v13 = vpop.f32.mrb[53].mxu0  ;;  %v4800_v9 = vld [vmem:[#allocation2 + $0x40] ss:$8 sps:$4 sm:$0xff]  }
 0x3d0   :  { %v1554_v15 = vadd.f32 %v4694_v1, %v1448_v13  ;;  %v3592_v17 = vpop.f32.mrb[54].mxu0  ;;  %v4806_v13 = vld [vmem:[#allocation2 + $0x50] ss:$8 sps:$4 sm:$0xff]  }
 0x3d1   :  { %v1557_v23 = vadd.f32 %v3592_v17, %v4694_v1  ;;  %v1451_v26 = vpop.f32.mrb[55].mxu0  ;;  %v1588_v32 = vmax.f32 %v1556_v12, 0.0  ;;  %v4803_v12 = vld [vmem:[#allocation2 + $0x54] ss:$8 sps:$4 sm:$0xff]   ;;  %v4812_v17 = vld [vmem:[#allocation2 + $0x60] ss:$8 sps:$4 sm:$0xff]  }
 0x3d2   :  { %v1555_v30 = vadd.f32 %v4694_v1, %v1451_v26  ;;  %v1586_v35 = vmax.f32 %v1554_v15, 0.0  ;;  %v4809_v15 = vld [vmem:[#allocation2 + $0x64] ss:$8 sps:$4 sm:$0xff]   ;;  %v4818_v26 = vld [vmem:[#allocation2 + $0x70] ss:$8 sps:$4 sm:$0xff]  }
 0x3d3   :  { %v1589_v34 = vmax.f32 %v1557_v23, 0.0  ;;  %v4815_v23 = vld [vmem:[#allocation2 + $0x74] ss:$8 sps:$4 sm:$0xff]  }
 0x3d4   :  { %v1587_v36 = vmax.f32 %v1555_v30, 0.0  ;;  %v4821_v30 = vld [vmem:[#allocation2 + $0x84] ss:$8 sps:$4 sm:$0xff]  }
 0x3d5   :  { %v4744_v38 = vpack.c.bf16 %v1589_v34, %v1588_v32  ;;  %v4824_v32 = vld [vmem:[#allocation2 + $0x80] ss:$8 sps:$4 sm:$0xff]   ;;  %v4827_v34 = vld [vmem:[#allocation2 + $0x94] ss:$8 sps:$4 sm:$0xff]  }
 0x3d6   :  { %v4746_v40 = vpack.c.bf16 %v1587_v36, %v1586_v35  ;;  %v4830_v35 = vld [vmem:[#allocation2 + $0x90] ss:$8 sps:$4 sm:$0xff]   ;;  %v4833_v36 = vld [vmem:[#allocation2 + $0xa4] ss:$8 sps:$4 sm:$0xff]  }
 0x3d8   :  { %3165 = vmatprep.subr.bf16.mxu1 %v4746_v40 }
 0x3d9   :  { %3166 = vmatpush3.bf16.msra.mxu1 %v4710_v50 }
 0x3da   :  { %3167 = vmatprep.subr.bf16.mxu1 %v4744_v38 }
 0x3dd   :  { %3168 = vmatpush3.bf16.msra.mxu1 %v4708_v48 }
 0x3de   :  { %v3595_v42 = vpop.f32.mrb[56].mxu0 }
 0x3df   :  { %v1560_v44 = vadd.f32 %v3595_v42, %v4694_v1  ;;  %v1464_v46 = vpop.f32.mrb[57].mxu0  ;;  %v4836_v42 = vld [vmem:[#allocation2 + $0xa0] ss:$8 sps:$4 sm:$0xff]  }
 0x3e0   :  { %v1558_v53 = vadd.f32 %v4694_v1, %v1464_v46  ;;  %v3596_v60 = vpop.f32.mrb[58].mxu0  ;;  %v3994_v46 = vld [vmem:[#allocation13 + $0x20] sm:$0xff]  }
 0x3e1   :  { %v1561_v45 = vadd.f32 %v3596_v60, %v4694_v1  ;;  %v1467_v43 = vpop.f32.mrb[59].mxu0  ;;  %v1592_v39 = vmax.f32 %v1560_v44, 0.0  ;;  %v4839_v44 = vld [vmem:[#allocation2 + $0xb4] ss:$8 sps:$4 sm:$0xff]   ;;  %v4842_v60 = vld [vmem:[#allocation2 + $0xb0] ss:$8 sps:$4 sm:$0xff]  }
 0x3e2   :  { %v1559_v41 = vadd.f32 %v4694_v1, %v1467_v43  ;;  %v1590_v28 = vmax.f32 %v1558_v53, 0.0  ;;  %v3995_v53 = vld [vmem:[#allocation13 + $0x28] sm:$0xff]   ;;  %v3996_v43 = vld [vmem:[#allocation13 + $0x30] sm:$0xff]  }
 0x3e3   :  { %v1593_v27 = vmax.f32 %v1561_v45, 0.0  ;;  %v4845_v45 = vld [vmem:[#allocation2 + $0xc4] ss:$8 sps:$4 sm:$0xff]  }
 0x3e4   :  { %v1591_v33 = vmax.f32 %v1559_v41, 0.0  ;;  %v3997_v41 = vld [vmem:[#allocation13 + $0x38] sm:$0xff]  }
 0x3e5   :  { %v4756_v11 = vpack.c.bf16 %v1593_v27, %v1592_v39  ;;  %v4848_v39 = vld [vmem:[#allocation2 + $0xc0] ss:$8 sps:$4 sm:$0xff]   ;;  %v4851_v27 = vld [vmem:[#allocation2 + $0xd4] ss:$8 sps:$4 sm:$0xff]  }
 0x3e6   :  { %v4758_v16 = vpack.c.bf16 %v1591_v33, %v1590_v28  ;;  %5057 = vst [vmem:[#allocation23_spill] sm:$0xff] %v4848_v39  ;;  %5058 = vst [vmem:[#allocation25_spill] sm:$0xff] %v4851_v27  ;;  %v4854_v28 = vld [vmem:[#allocation2 + $0xd0] ss:$8 sps:$4 sm:$0xff]   ;;  %v4857_v33 = vld [vmem:[#allocation2 + $0xe4] ss:$8 sps:$4 sm:$0xff]  }
 0x3e7   :  { %5059 = vst [vmem:[#allocation27_spill] sm:$0xff] %v4854_v28  ;;  %5060 = vst [vmem:[#allocation28_spill] sm:$0xff] %v4857_v33 }
 0x3e8   :  { %3169 = vmatprep.subr.bf16.mxu1 %v4758_v16 }
 0x3e9   :  { %3170 = vmatpush3.bf16.msra.mxu1 %v4718_v54 }
 0x3ea   :  { %3171 = vmatprep.subr.bf16.mxu1 %v4756_v11 }
 0x3ed   :  { %3172 = vmatpush3.bf16.msra.mxu1 %v4716_v52 }
 0x3ee   :  { %v3599_v51 = vpop.f32.mrb[60].mxu0 }
 0x3ef   :  { %v1564_v55 = vadd.f32 %v3599_v51, %v4694_v1  ;;  %v1480_v49 = vpop.f32.mrb[61].mxu0  ;;  %v4860_v51 = vld [vmem:[#allocation2 + $0xe0] ss:$8 sps:$4 sm:$0xff]  }
 0x3f0   :  { %v1562_v56 = vadd.f32 %v4694_v1, %v1480_v49  ;;  %v3600_v57 = vpop.f32.mrb[62].mxu0  ;;  %5061 = vst [vmem:[#allocation26_spill] sm:$0xff] %v4860_v51  ;;  %v4866_v49 = vld [vmem:[#allocation2 + $0xf0] ss:$8 sps:$4 sm:$0xff]  }
 0x3f1   :  { %v1565_v47 = vadd.f32 %v3600_v57, %v4694_v1  ;;  %v1483_v58 = vpop.f32.mrb[63].mxu0  ;;  %v1596_v62 = vmax.f32 %v1564_v55, 0.0  ;;  %v4863_v55 = vld [vmem:[#allocation2 + $0xf4] ss:$8 sps:$4 sm:$0xff]   ;;  %5063 = vst [vmem:[#allocation30_spill] sm:$0xff] %v4866_v49  ;;  %v3998_v57 = vld [vmem:[#allocation11] sm:$0xff]  }
 0x3f2   :  { %v1563_v59 = vadd.f32 %v4694_v1, %v1483_v58  ;;  %v1594_v37 = vmax.f32 %v1562_v56, 0.0  ;;  %v3992_v1 = vld [vmem:[#allocation13 + $0x10] sm:$0xff]   ;;  %5062 = vst [vmem:[#allocation29_spill] sm:$0xff] %v4863_v55  ;;  %v4045_v56 = vld [vmem:[#allocation2 + $0x4] ss:$8 sps:$4 sm:$0xff]  }
 0x3f3   :  { %v1597_v63 = vmax.f32 %v1565_v47, 0.0  ;;  %3605 = vmatprep.subr.bf16.mxu0 %v3992_v1 }
 0x3f4   :  { %v1595_v61 = vmax.f32 %v1563_v59, 0.0  ;;  %3606 = vmatpush3.bf16.msra.mxu0 %v3992_v1 }
 0x3f5   :  { %v4768_v25 = vpack.c.bf16 %v1597_v63, %v1596_v62  ;;  %3607 = vmatprep.subr.bf16.mxu0 %v3993_v29 }
 0x3f6   :  { %v4770_v18 = vpack.c.bf16 %v1595_v61, %v1594_v37 }
 0x3f8   :  { %3173 = vmatprep.subr.bf16.mxu1 %v4770_v18  ;;  %3608 = vmatpush3.bf16.msra.mxu0 %v3993_v29 }
 0x3f9   :  { %3174 = vmatpush3.bf16.msra.mxu1 %v4726_v10  ;;  %3609 = vmatprep.subr.bf16.mxu0 %v3994_v46 }
 0x3fa   :  { %3175 = vmatprep.subr.bf16.mxu1 %v4768_v25 }
 0x3fc   :  { %3610 = vmatpush3.bf16.msra.mxu0 %v3994_v46 }
 0x3fd   :  { %3176 = vmatpush3.bf16.msra.mxu1 %v4724_v14  ;;  %3611 = vmatprep.subr.bf16.mxu0 %v3995_v53 }
 0x400   :  { %1647 = vmatmul.mubr.bf16.vlgmr.msra.gmra.mrb[96].mxu1 %v4776_v24  ;;  %3612 = vmatpush3.bf16.msra.mxu0 %v3995_v53 }
 0x401   :  { %1654 = vmatprep.mubr.bf16.mxu1 %v4779_v31  ;;  %3613 = vmatprep.subr.bf16.mxu0 %v3996_v43 }
 0x404   :  { %3614 = vmatpush3.bf16.msra.mxu0 %v3996_v43 }
 0x405   :  { %3615 = vmatprep.subr.bf16.mxu0 %v3997_v41 }
 0x408   :  { %1655 = vmatmul.mubr.bf16.gmra.mrb[100].mxu1 %v4782_v0  ;;  %3616 = vmatpush3.bf16.msra.mxu0 %v3997_v41  ;;  %v3999_v41 = vld [vmem:[#allocation11 + $0x8] sm:$0xff]  }
 0x409   :  { %1662 = vmatprep.mubr.bf16.mxu1 %v4785_v2  ;;  %3649 = vmatprep.subr.bf16.mxu0 %v3998_v57 }
 0x410   :  { %1663 = vmatmul.mubr.bf16.gmra.mrb[104].mxu1 %v4788_v3 }
 0x411   :  { %1670 = vmatprep.mubr.bf16.mxu1 %v4791_v4 }
 0x418   :  { %1671 = vmatmul.mubr.bf16.gmra.mrb[108].mxu1 %v4794_v5 }
 0x419   :  { %1678 = vmatprep.mubr.bf16.mxu1 %v4797_v6 }
 0x420   :  { %1679 = vmatmul.mubr.bf16.gmra.mrb[112].mxu1 %v4800_v9 }
 0x421   :  { %1686 = vmatprep.mubr.bf16.mxu1 %v4803_v12 }
 0x428   :  { %1687 = vmatmul.mubr.bf16.gmra.mrb[116].mxu1 %v4806_v13 }
 0x429   :  { %1694 = vmatprep.mubr.bf16.mxu1 %v4809_v15 }
 0x430   :  { %1695 = vmatmul.mubr.bf16.gmra.mrb[120].mxu1 %v4812_v17 }
 0x431   :  { %1702 = vmatprep.mubr.bf16.mxu1 %v4815_v23 }
 0x438   :  { %1703 = vmatmul.mubr.bf16.gmra.mrb[124].mxu1 %v4818_v26 }
 0x439   :  { %1710 = vmatprep.mubr.bf16.mxu1 %v4821_v30 }
 0x440   :  { %1711 = vmatmul.mubr.bf16.gmra.mrb[128].mxu1 %v4824_v32 }
 0x441   :  { %1718 = vmatprep.mubr.bf16.mxu1 %v4827_v34 }
 0x448   :  { %1719 = vmatmul.mubr.bf16.gmra.mrb[132].mxu1 %v4830_v35 }
 0x449   :  { %1726 = vmatprep.mubr.bf16.mxu1 %v4833_v36 }
 0x450   :  { %1727 = vmatmul.mubr.bf16.gmra.mrb[136].mxu1 %v4836_v42 }
 0x451   :  { %1734 = vmatprep.mubr.bf16.mxu1 %v4839_v44 }
 0x458   :  { %1735 = vmatmul.mubr.bf16.gmra.mrb[140].mxu1 %v4842_v60 }
 0x459   :  { %1742 = vmatprep.mubr.bf16.mxu1 %v4845_v45 }
 0x460   :  { %1743 = vmatmul.mubr.bf16.gmra.mrb[144].mxu1 %v4848_v39 }
 0x461   :  { %1750 = vmatprep.mubr.bf16.mxu1 %v4851_v27 }
 0x468   :  { %1751 = vmatmul.mubr.bf16.gmra.mrb[148].mxu1 %v4854_v28 }
 0x469   :  { %1758 = vmatprep.mubr.bf16.mxu1 %v4857_v33 }
 0x470   :  { %1759 = vmatmul.mubr.bf16.gmra.mrb[152].mxu1 %v4860_v51 }
 0x471   :  { %1766 = vmatprep.mubr.bf16.mxu1 %v4863_v55 }
 0x478   :  { %1767 = vmatmul.mubr.bf16.gmra.mrb[156].mxu1 %v4866_v49 }
 0x479   :  { %1823 = vmatprep.mubr.bf16.mxu1 %v4045_v56 }
 0x4d3   :  { %v3177_v47 = vpop.f32.mrb[96].mxu1 }
 0x4d4   :  { %v3178_v58 = vpop.f32.mrb[97].mxu1 }
 0x4d5   :  { %v3179_v59 = vadd.f32 %v3178_v58, %v3177_v47  ;;  %v3180_v62 = vpop.f32.mrb[98].mxu1 }
 0x4d6   :  { %v3181_v63 = vpop.f32.mrb[99].mxu1 }
 0x4d7   :  { %v3182_v37 = vadd.f32 %v3181_v63, %v3180_v62 }
 0x4d9   :  { %v4869_v61 = vpack.c.bf16 %v3182_v37, %v3179_v59  ;;  %v4000_v59 = vld [vmem:[#allocation11 + $0x10] sm:$0xff]  }
 0x4db   :  { %v3183_v20 = vpop.f32.mrb[100].mxu1  ;;  %3617 = vmatprep.mubr.bf16.mxu0 %v4869_v61 }
 0x4dc   :  { %v3184_v22 = vpop.f32.mrb[101].mxu1 }
 0x4dd   :  { %v3185_v1 = vadd.f32 %v3184_v22, %v3183_v20  ;;  %v3186_v29 = vpop.f32.mrb[102].mxu1  ;;  %v4001_v20 = vld [vmem:[#allocation11 + $0x18] sm:$0xff]  }
 0x4de   :  { %v3187_v46 = vpop.f32.mrb[103].mxu1 }
 0x4df   :  { %v3188_v53 = vadd.f32 %v3187_v46, %v3186_v29 }
 0x4e1   :  { %v4872_v43 = vpack.c.bf16 %v3188_v53, %v3185_v1 }
 0x4e3   :  { %v3189_v56 = vpop.f32.mrb[104].mxu1  ;;  %3618 = vmatmul.mubr.bf16.vlgmr.msra.gmra.mrb[64].mxu0 %v4872_v43 }
 0x4e4   :  { %v3190_v47 = vpop.f32.mrb[105].mxu1  ;;  %3650 = vmatpush3.bf16.msra.mxu0 %v3998_v57  ;;  %v4002_v57 = vld [vmem:[#allocation11 + $0x20] sm:$0xff]  }
 0x4e5   :  { %v3191_v58 = vadd.f32 %v3190_v47, %v3189_v56  ;;  %v3192_v62 = vpop.f32.mrb[106].mxu1  ;;  %3651 = vmatprep.subr.bf16.mxu0 %v3999_v41 }
 0x4e6   :  { %v3193_v63 = vpop.f32.mrb[107].mxu1 }
 0x4e7   :  { %v3194_v37 = vadd.f32 %v3193_v63, %v3192_v62 }
 0x4e8   :  { %3652 = vmatpush3.bf16.msra.mxu0 %v3999_v41  ;;  %v4003_v41 = vld [vmem:[#allocation11 + $0x28] sm:$0xff]  }
 0x4e9   :  { %v4875_v49 = vpack.c.bf16 %v3194_v37, %v3191_v58  ;;  %3653 = vmatprep.subr.bf16.mxu0 %v4000_v59 }
 0x4eb   :  { %v3195_v22 = vpop.f32.mrb[108].mxu1  ;;  %3621 = vmatprep.mubr.bf16.mxu0 %v4875_v49 }
 0x4ec   :  { %v3196_v1 = vpop.f32.mrb[109].mxu1  ;;  %3654 = vmatpush3.bf16.msra.mxu0 %v4000_v59  ;;  %v4004_v59 = vld [vmem:[#allocation11 + $0x30] sm:$0xff]  }
 0x4ed   :  { %v3197_v29 = vadd.f32 %v3196_v1, %v3195_v22  ;;  %v3198_v46 = vpop.f32.mrb[110].mxu1  ;;  %3655 = vmatprep.subr.bf16.mxu0 %v4001_v20 }
 0x4ee   :  { %v3199_v53 = vpop.f32.mrb[111].mxu1 }
 0x4ef   :  { %v3200_v56 = vadd.f32 %v3199_v53, %v3198_v46 }
 0x4f0   :  { %3656 = vmatpush3.bf16.msra.mxu0 %v4001_v20  ;;  %v4005_v20 = vld [vmem:[#allocation11 + $0x38] sm:$0xff]  }
 0x4f1   :  { %v4878_v47 = vpack.c.bf16 %v3200_v56, %v3197_v29  ;;  %3657 = vmatprep.subr.bf16.mxu0 %v4002_v57 }
 0x4f3   :  { %v3201_v58 = vpop.f32.mrb[112].mxu1  ;;  %3622 = vmatmul.mubr.bf16.gmra.mrb[68].mxu0 %v4878_v47 }
 0x4f4   :  { %v3202_v62 = vpop.f32.mrb[113].mxu1  ;;  %3658 = vmatpush3.bf16.msra.mxu0 %v4002_v57 }
 0x4f5   :  { %v3203_v63 = vadd.f32 %v3202_v62, %v3201_v58  ;;  %v3204_v37 = vpop.f32.mrb[114].mxu1  ;;  %3659 = vmatprep.subr.bf16.mxu0 %v4003_v41 }
 0x4f6   :  { %v3205_v22 = vpop.f32.mrb[115].mxu1 }
 0x4f7   :  { %v3206_v1 = vadd.f32 %v3205_v22, %v3204_v37 }
 0x4f8   :  { %3660 = vmatpush3.bf16.msra.mxu0 %v4003_v41 }
 0x4f9   :  { %v4881_v55 = vpack.c.bf16 %v3206_v1, %v3203_v63  ;;  %3661 = vmatprep.subr.bf16.mxu0 %v4004_v59 }
 0x4fb   :  { %v3207_v29 = vpop.f32.mrb[116].mxu1  ;;  %3625 = vmatprep.mubr.bf16.mxu0 %v4881_v55 }
 0x4fc   :  { %v3208_v46 = vpop.f32.mrb[117].mxu1  ;;  %3662 = vmatpush3.bf16.msra.mxu0 %v4004_v59 }
 0x4fd   :  { %v3209_v53 = vadd.f32 %v3208_v46, %v3207_v29  ;;  %v3210_v56 = vpop.f32.mrb[118].mxu1  ;;  %3663 = vmatprep.subr.bf16.mxu0 %v4005_v20 }
 0x4fe   :  { %v3211_v57 = vpop.f32.mrb[119].mxu1 }
 0x4ff   :  { %v3212_v58 = vadd.f32 %v3211_v57, %v3210_v56 }
 0x500   :  { %3664 = vmatpush3.bf16.msra.mxu0 %v4005_v20 }
 0x501   :  { %v4884_v62 = vpack.c.bf16 %v3212_v58, %v3209_v53 }
 0x503   :  { %v3213_v51 = vpop.f32.mrb[120].mxu1  ;;  %3626 = vmatmul.mubr.bf16.gmra.mrb[72].mxu0 %v4884_v62 }
 0x504   :  { %v3214_v41 = vpop.f32.mrb[121].mxu1 }
 0x505   :  { %v3215_v63 = vadd.f32 %v3214_v41, %v3213_v51  ;;  %v3216_v37 = vpop.f32.mrb[122].mxu1 }
 0x506   :  { %v3217_v22 = vpop.f32.mrb[123].mxu1 }
 0x507   :  { %v3218_v1 = vadd.f32 %v3217_v22, %v3216_v37 }
 0x509   :  { %v4887_v33 = vpack.c.bf16 %v3218_v1, %v3215_v63 }
 0x50b   :  { %v3219_v28 = vpop.f32.mrb[124].mxu1  ;;  %3629 = vmatprep.mubr.bf16.mxu0 %v4887_v33 }
 0x50c   :  { %v3220_v59 = vpop.f32.mrb[125].mxu1 }
 0x50d   :  { %v3221_v29 = vadd.f32 %v3220_v59, %v3219_v28  ;;  %v3222_v46 = vpop.f32.mrb[126].mxu1 }
 0x50e   :  { %v3223_v56 = vpop.f32.mrb[127].mxu1 }
 0x50f   :  { %v3224_v20 = vadd.f32 %v3223_v56, %v3222_v46 }
 0x511   :  { %v4890_v53 = vpack.c.bf16 %v3224_v20, %v3221_v29 }
 0x513   :  { %v3225_v57 = vpop.f32.mrb[128].mxu1  ;;  %3630 = vmatmul.mubr.bf16.gmra.mrb[76].mxu0 %v4890_v53 }
 0x514   :  { %v3226_v58 = vpop.f32.mrb[129].mxu1 }
 0x515   :  { %v3227_v51 = vadd.f32 %v3226_v58, %v3225_v57  ;;  %v3228_v41 = vpop.f32.mrb[130].mxu1 }
 0x516   :  { %v3229_v27 = vpop.f32.mrb[131].mxu1 }
 0x517   :  { %v3230_v37 = vadd.f32 %v3229_v27, %v3228_v41 }
 0x519   :  { %v1783_v63 = vpack.c.bf16 %v3230_v37, %v3227_v51 }
 0x51b   :  { %v3231_v22 = vpop.f32.mrb[132].mxu1  ;;  %3273 = vmatprep.subr.bf16.mxu1 %v1783_v63  ;;  %3633 = vmatprep.mubr.bf16.mxu0 %v1783_v63 }
 0x51c   :  { %v3232_v1 = vpop.f32.mrb[133].mxu1  ;;  %3274 = vmatpush3.bf16.msra.mxu1 %v4869_v61 }
 0x51d   :  { %v3233_v28 = vadd.f32 %v3232_v1, %v3231_v22  ;;  %v3234_v59 = vpop.f32.mrb[134].mxu1 }
 0x51e   :  { %v3235_v46 = vpop.f32.mrb[135].mxu1 }
 0x51f   :  { %v3236_v29 = vadd.f32 %v3235_v46, %v3234_v59 }
 0x521   :  { %v1784_v56 = vpack.c.bf16 %v3236_v29, %v3233_v28 }
 0x523   :  { %v3237_v20 = vpop.f32.mrb[136].mxu1  ;;  %3275 = vmatprep.subr.bf16.mxu1 %v1784_v56  ;;  %3634 = vmatmul.mubr.bf16.gmra.mrb[80].mxu0 %v1784_v56 }
 0x524   :  { %v3238_v39 = vpop.f32.mrb[137].mxu1  ;;  %3276 = vmatpush3.bf16.msra.mxu1 %v4872_v43 }
 0x525   :  { %v3239_v57 = vadd.f32 %v3238_v39, %v3237_v20  ;;  %v3240_v27 = vpop.f32.mrb[138].mxu1 }
 0x526   :  { %v3241_v58 = vpop.f32.mrb[139].mxu1 }
 0x527   :  { %v3242_v51 = vadd.f32 %v3241_v58, %v3240_v27 }
 0x529   :  { %v1785_v41 = vpack.c.bf16 %v3242_v51, %v3239_v57 }
 0x52b   :  { %v3243_v37 = vpop.f32.mrb[140].mxu1  ;;  %3277 = vmatprep.subr.bf16.mxu1 %v1785_v41  ;;  %3637 = vmatprep.mubr.bf16.mxu0 %v1785_v41 }
 0x52c   :  { %v3244_v61 = vpop.f32.mrb[141].mxu1  ;;  %3278 = vmatpush3.bf16.msra.mxu1 %v4875_v49 }
 0x52d   :  { %v3245_v63 = vadd.f32 %v3244_v61, %v3243_v37  ;;  %v3246_v22 = vpop.f32.mrb[142].mxu1 }
 0x52e   :  { %v3247_v1 = vpop.f32.mrb[143].mxu1 }
 0x52f   :  { %v3248_v28 = vadd.f32 %v3247_v1, %v3246_v22 }
 0x531   :  { %v1786_v59 = vpack.c.bf16 %v3248_v28, %v3245_v63 }
 0x533   :  { %v3249_v46 = vpop.f32.mrb[144].mxu1  ;;  %3279 = vmatprep.subr.bf16.mxu1 %v1786_v59  ;;  %3638 = vmatmul.mubr.bf16.gmra.mrb[84].mxu0 %v1786_v59 }
 0x534   :  { %v3250_v43 = vpop.f32.mrb[145].mxu1  ;;  %3280 = vmatpush3.bf16.msra.mxu1 %v4878_v47 }
 0x535   :  { %v3251_v39 = vadd.f32 %v3250_v43, %v3249_v46  ;;  %v3252_v29 = vpop.f32.mrb[146].mxu1 }
 0x536   :  { %v3253_v56 = vpop.f32.mrb[147].mxu1 }
 0x537   :  { %v3254_v20 = vadd.f32 %v3253_v56, %v3252_v29 }
 0x539   :  { %v1787_v57 = vpack.c.bf16 %v3254_v20, %v3251_v39 }
 0x53b   :  { %v3255_v27 = vpop.f32.mrb[148].mxu1  ;;  %3281 = vmatprep.subr.bf16.mxu1 %v1787_v57  ;;  %3641 = vmatprep.mubr.bf16.mxu0 %v1787_v57  ;;  %v4006_v57 = vld [vmem:[#allocation14] sm:$0xff]  }
 0x53c   :  { %v3256_v49 = vpop.f32.mrb[149].mxu1  ;;  %3282 = vmatpush3.bf16.msra.mxu1 %v4881_v55  ;;  %3697 = vmatprep.subr.bf16.mxu0 %v4006_v57 }
 0x53d   :  { %v3257_v58 = vadd.f32 %v3256_v49, %v3255_v27  ;;  %v3258_v51 = vpop.f32.mrb[150].mxu1 }
 0x53e   :  { %v3259_v41 = vpop.f32.mrb[151].mxu1 }
 0x53f   :  { %v3260_v37 = vadd.f32 %v3259_v41, %v3258_v51 }
 0x541   :  { %v1788_v61 = vpack.c.bf16 %v3260_v37, %v3257_v58 }
 0x543   :  { %v3261_v63 = vpop.f32.mrb[152].mxu1  ;;  %3283 = vmatprep.subr.bf16.mxu1 %v1788_v61  ;;  %3642 = vmatmul.mubr.bf16.gmra.mrb[88].mxu0 %v1788_v61 }
 0x544   :  { %v3262_v47 = vpop.f32.mrb[153].mxu1  ;;  %3284 = vmatpush3.bf16.msra.mxu1 %v4884_v62  ;;  %v4007_v62 = vld [vmem:[#allocation14 + $0x8] sm:$0xff]  }
 0x545   :  { %v3263_v22 = vadd.f32 %v3262_v47, %v3261_v63  ;;  %v3264_v1 = vpop.f32.mrb[154].mxu1 }
 0x546   :  { %v3265_v28 = vpop.f32.mrb[155].mxu1 }
 0x547   :  { %v3266_v59 = vadd.f32 %v3265_v28, %v3264_v1 }
 0x549   :  { %v1789_v46 = vpack.c.bf16 %v3266_v59, %v3263_v22 }
 0x54b   :  { %v3267_v43 = vpop.f32.mrb[156].mxu1  ;;  %3285 = vmatprep.subr.bf16.mxu1 %v1789_v46  ;;  %3645 = vmatprep.mubr.bf16.mxu0 %v1789_v46 }
 0x54c   :  { %v3268_v55 = vpop.f32.mrb[157].mxu1  ;;  %3286 = vmatpush3.bf16.msra.mxu1 %v4887_v33  ;;  %v4008_v33 = vld [vmem:[#allocation14 + $0x10] sm:$0xff]  }
 0x54d   :  { %v3269_v39 = vadd.f32 %v3268_v55, %v3267_v43  ;;  %v3270_v29 = vpop.f32.mrb[158].mxu1 }
 0x54e   :  { %v3271_v56 = vpop.f32.mrb[159].mxu1 }
 0x54f   :  { %v3272_v20 = vadd.f32 %v3271_v56, %v3270_v29 }
 0x551   :  { %v1790_v27 = vpack.c.bf16 %v3272_v20, %v3269_v39 }
 0x553   :  { %3287 = vmatprep.subr.bf16.mxu1 %v1790_v27  ;;  %3646 = vmatmul.mubr.bf16.gmra.mrb[92].mxu0 %v1790_v27 }
 0x554   :  { %3288 = vmatpush3.bf16.msra.mxu1 %v4890_v53  ;;  %3665 = vmatprep.mubr.bf16.mxu0 %v4702_v21  ;;  %v4009_v53 = vld [vmem:[#allocation14 + $0x18] sm:$0xff]   ;;  %v4010_v21 = vld [vmem:[#allocation14 + $0x20] sm:$0xff]  }
 0x557   :  { %1824 = vmatmul.mubr.bf16.vlgmr.msra.gmra.mrb[160].mxu1 %v4776_v24 }
 0x558   :  { %1831 = vmatprep.mubr.bf16.mxu1 %v4779_v31 }
 0x55b   :  { %3666 = vmatmul.mubr.bf16.vlgmr.msra.gmra.mrb[64].mxu0 %v4700_v19  ;;  %v4011_v19 = vld [vmem:[#allocation14 + $0x28] sm:$0xff]  }
 0x55c   :  { %3669 = vmatprep.mubr.bf16.mxu0 %v4710_v50  ;;  %3698 = vmatpush3.bf16.msra.mxu0 %v4006_v57  ;;  %v4013_v50 = vld [vmem:[#allocation14 + $0x38] sm:$0xff]  }
 0x55d   :  { %3699 = vmatprep.subr.bf16.mxu0 %v4007_v62 }
 0x55f   :  { %1832 = vmatmul.mubr.bf16.gmra.mrb[164].mxu1 %v4782_v0 }
 0x560   :  { %1839 = vmatprep.mubr.bf16.mxu1 %v4785_v2  ;;  %3700 = vmatpush3.bf16.msra.mxu0 %v4007_v62 }
 0x561   :  { %3701 = vmatprep.subr.bf16.mxu0 %v4008_v33 }
 0x563   :  { %3670 = vmatmul.mubr.bf16.gmra.mrb[68].mxu0 %v4708_v48  ;;  %v4012_v48 = vld [vmem:[#allocation14 + $0x30] sm:$0xff]  }
 0x564   :  { %3673 = vmatprep.mubr.bf16.mxu0 %v4718_v54  ;;  %3702 = vmatpush3.bf16.msra.mxu0 %v4008_v33  ;;  %v5065_v54 = vld [vmem:[#allocation25_spill] sm:$0xff] }
 0x565   :  { %3703 = vmatprep.subr.bf16.mxu0 %v4009_v53 }
 0x567   :  { %1840 = vmatmul.mubr.bf16.gmra.mrb[168].mxu1 %v4788_v3 }
 0x568   :  { %1847 = vmatprep.mubr.bf16.mxu1 %v4791_v4  ;;  %3704 = vmatpush3.bf16.msra.mxu0 %v4009_v53 }
 0x569   :  { %3705 = vmatprep.subr.bf16.mxu0 %v4010_v21 }
 0x56b   :  { %3674 = vmatmul.mubr.bf16.gmra.mrb[72].mxu0 %v4716_v52  ;;  %v5064_v52 = vld [vmem:[#allocation23_spill] sm:$0xff] }
 0x56c   :  { %3677 = vmatprep.mubr.bf16.mxu0 %v4726_v10  ;;  %3706 = vmatpush3.bf16.msra.mxu0 %v4010_v21  ;;  %v5067_v10 = vld [vmem:[#allocation28_spill] sm:$0xff] }
 0x56d   :  { %3707 = vmatprep.subr.bf16.mxu0 %v4011_v19 }
 0x56f   :  { %1848 = vmatmul.mubr.bf16.gmra.mrb[172].mxu1 %v4794_v5 }
 0x570   :  { %1855 = vmatprep.mubr.bf16.mxu1 %v4797_v6  ;;  %3708 = vmatpush3.bf16.msra.mxu0 %v4011_v19 }
 0x571   :  { %3709 = vmatprep.subr.bf16.mxu0 %v4012_v48 }
 0x573   :  { %3678 = vmatmul.mubr.bf16.gmra.mrb[76].mxu0 %v4724_v14  ;;  %v5066_v14 = vld [vmem:[#allocation27_spill] sm:$0xff] }
 0x574   :  { %3681 = vmatprep.mubr.bf16.mxu0 %v4734_v8  ;;  %3710 = vmatpush3.bf16.msra.mxu0 %v4012_v48  ;;  %v5069_v8 = vld [vmem:[#allocation29_spill] sm:$0xff] }
 0x575   :  { %3711 = vmatprep.subr.bf16.mxu0 %v4013_v50 }
 0x577   :  { %1856 = vmatmul.mubr.bf16.gmra.mrb[176].mxu1 %v4800_v9 }
 0x578   :  { %1863 = vmatprep.mubr.bf16.mxu1 %v4803_v12  ;;  %3712 = vmatpush3.bf16.msra.mxu0 %v4013_v50 }
 0x57b   :  { %3682 = vmatmul.mubr.bf16.gmra.mrb[80].mxu0 %v4732_v7  ;;  %v5068_v7 = vld [vmem:[#allocation26_spill] sm:$0xff] }
 0x57c   :  { %3685 = vmatprep.mubr.bf16.mxu0 %v4746_v40 }
 0x57f   :  { %1864 = vmatmul.mubr.bf16.gmra.mrb[180].mxu1 %v4806_v13 }
 0x580   :  { %1871 = vmatprep.mubr.bf16.mxu1 %v4809_v15 }
 0x583   :  { %3686 = vmatmul.mubr.bf16.gmra.mrb[84].mxu0 %v4744_v38  ;;  %v5070_v38 = vld [vmem:[#allocation30_spill] sm:$0xff] }
 0x584   :  { %3689 = vmatprep.mubr.bf16.mxu0 %v4758_v16 }
 0x587   :  { %1872 = vmatmul.mubr.bf16.gmra.mrb[184].mxu1 %v4812_v17 }
 0x588   :  { %1879 = vmatprep.mubr.bf16.mxu1 %v4815_v23 }
 0x58b   :  { %3690 = vmatmul.mubr.bf16.gmra.mrb[88].mxu0 %v4756_v11 }
 0x58c   :  { %3693 = vmatprep.mubr.bf16.mxu0 %v4770_v18 }
 0x58f   :  { %1880 = vmatmul.mubr.bf16.gmra.mrb[188].mxu1 %v4818_v26 }
 0x590   :  { %1887 = vmatprep.mubr.bf16.mxu1 %v4821_v30 }
 0x593   :  { %3694 = vmatmul.mubr.bf16.gmra.mrb[92].mxu0 %v4768_v25 }
 0x597   :  { %1888 = vmatmul.mubr.bf16.gmra.mrb[192].mxu1 %v4824_v32 }
 0x598   :  { %1895 = vmatprep.mubr.bf16.mxu1 %v4827_v34 }
 0x59f   :  { %1896 = vmatmul.mubr.bf16.gmra.mrb[196].mxu1 %v4830_v35 }
 0x5a0   :  { %1903 = vmatprep.mubr.bf16.mxu1 %v4833_v36 }
 0x5a7   :  { %1904 = vmatmul.mubr.bf16.gmra.mrb[200].mxu1 %v4836_v42 }
 0x5a8   :  { %1911 = vmatprep.mubr.bf16.mxu1 %v4839_v44 }
 0x5af   :  { %1912 = vmatmul.mubr.bf16.gmra.mrb[204].mxu1 %v4842_v60 }
 0x5b0   :  { %1919 = vmatprep.mubr.bf16.mxu1 %v4845_v45 }
 0x5b7   :  { %1920 = vmatmul.mubr.bf16.gmra.mrb[208].mxu1 %v5064_v52 }
 0x5b8   :  { %1927 = vmatprep.mubr.bf16.mxu1 %v5065_v54 }
 0x5bf   :  { %1928 = vmatmul.mubr.bf16.gmra.mrb[212].mxu1 %v5066_v14 }
 0x5c0   :  { %1935 = vmatprep.mubr.bf16.mxu1 %v5067_v10 }
 0x5c7   :  { %1936 = vmatmul.mubr.bf16.gmra.mrb[216].mxu1 %v5068_v7 }
 0x5c8   :  { %1943 = vmatprep.mubr.bf16.mxu1 %v5069_v8 }
 0x5cf   :  { %1944 = vmatmul.mubr.bf16.gmra.mrb[220].mxu1 %v5070_v38 }
 0x62a   :  { %v3289_v40 = vpop.f32.mrb[160].mxu1 }
 0x62b   :  { %v3290_v11 = vpop.f32.mrb[161].mxu1 }
 0x62c   :  { %v3291_v16 = vadd.f32 %v3290_v11, %v3289_v40  ;;  %v3292_v25 = vpop.f32.mrb[162].mxu1 }
 0x62d   :  { %v3293_v18 = vpop.f32.mrb[163].mxu1 }
 0x62e   :  { %v3294_v24 = vadd.f32 %v3293_v18, %v3292_v25 }
 0x630   :  { %v1952_v31 = vpack.c.bf16 %v3294_v24, %v3291_v16 }
 0x632   :  { %v3295_v0 = vpop.f32.mrb[164].mxu1  ;;  %3713 = vmatprep.mubr.bf16.mxu0 %v1952_v31 }
 0x633   :  { %v3296_v2 = vpop.f32.mrb[165].mxu1 }
 0x634   :  { %v3297_v3 = vadd.f32 %v3296_v2, %v3295_v0  ;;  %v3298_v4 = vpop.f32.mrb[166].mxu1 }
 0x635   :  { %v3299_v5 = vpop.f32.mrb[167].mxu1 }
 0x636   :  { %v3300_v6 = vadd.f32 %v3299_v5, %v3298_v4 }
 0x638   :  { %v1953_v9 = vpack.c.bf16 %v3300_v6, %v3297_v3 }
 0x63a   :  { %3714 = vmatmul.mubr.bf16.vlgmr.msra.gmra.mrb[64].mxu0 %v1953_v9  ;;  %v3301_v12 = vpop.f32.mrb[168].mxu1 }
 0x63b   :  { %v3302_v13 = vpop.f32.mrb[169].mxu1 }
 0x63c   :  { %v3303_v15 = vadd.f32 %v3302_v13, %v3301_v12  ;;  %v3304_v17 = vpop.f32.mrb[170].mxu1 }
 0x63d   :  { %v3305_v23 = vpop.f32.mrb[171].mxu1 }
 0x63e   :  { %v3306_v26 = vadd.f32 %v3305_v23, %v3304_v17 }
 0x640   :  { %v1954_v30 = vpack.c.bf16 %v3306_v26, %v3303_v15 }
 0x642   :  { %v3307_v32 = vpop.f32.mrb[172].mxu1  ;;  %3717 = vmatprep.mubr.bf16.mxu0 %v1954_v30 }
 0x643   :  { %v3308_v34 = vpop.f32.mrb[173].mxu1 }
 0x644   :  { %v3309_v35 = vadd.f32 %v3308_v34, %v3307_v32  ;;  %v3310_v36 = vpop.f32.mrb[174].mxu1 }
 0x645   :  { %v3311_v42 = vpop.f32.mrb[175].mxu1 }
 0x646   :  { %v3312_v44 = vadd.f32 %v3311_v42, %v3310_v36 }
 0x648   :  { %v1955_v60 = vpack.c.bf16 %v3312_v44, %v3309_v35 }
 0x64a   :  { %3718 = vmatmul.mubr.bf16.gmra.mrb[68].mxu0 %v1955_v60  ;;  %v3313_v45 = vpop.f32.mrb[176].mxu1 }
 0x64b   :  { %v3314_v49 = vpop.f32.mrb[177].mxu1 }
 0x64c   :  { %v3315_v58 = vadd.f32 %v3314_v49, %v3313_v45  ;;  %v3316_v51 = vpop.f32.mrb[178].mxu1 }
 0x64d   :  { %v3317_v41 = vpop.f32.mrb[179].mxu1 }
 0x64e   :  { %v3318_v37 = vadd.f32 %v3317_v41, %v3316_v51 }
 0x650   :  { %v1956_v61 = vpack.c.bf16 %v3318_v37, %v3315_v58 }
 0x652   :  { %v3319_v63 = vpop.f32.mrb[180].mxu1  ;;  %3721 = vmatprep.mubr.bf16.mxu0 %v1956_v61 }
 0x653   :  { %v3320_v47 = vpop.f32.mrb[181].mxu1 }
 0x654   :  { %v3321_v22 = vadd.f32 %v3320_v47, %v3319_v63  ;;  %v3322_v1 = vpop.f32.mrb[182].mxu1 }
 0x655   :  { %v3323_v28 = vpop.f32.mrb[183].mxu1 }
 0x656   :  { %v3324_v59 = vadd.f32 %v3323_v28, %v3322_v1 }
 0x658   :  { %v1957_v46 = vpack.c.bf16 %v3324_v59, %v3321_v22 }
 0x65a   :  { %3722 = vmatmul.mubr.bf16.gmra.mrb[72].mxu0 %v1957_v46  ;;  %v3325_v43 = vpop.f32.mrb[184].mxu1 }
 0x65b   :  { %v3326_v55 = vpop.f32.mrb[185].mxu1 }
 0x65c   :  { %v3327_v39 = vadd.f32 %v3326_v55, %v3325_v43  ;;  %v3328_v29 = vpop.f32.mrb[186].mxu1 }
 0x65d   :  { %v3329_v56 = vpop.f32.mrb[187].mxu1 }
 0x65e   :  { %v3330_v20 = vadd.f32 %v3329_v56, %v3328_v29 }
 0x660   :  { %v1958_v57 = vpack.c.bf16 %v3330_v20, %v3327_v39 }
 0x662   :  { %v3331_v27 = vpop.f32.mrb[188].mxu1  ;;  %3725 = vmatprep.mubr.bf16.mxu0 %v1958_v57  ;;  %v4951_v57 = vld [vmem:[%s5009_s9] ss:$0 sm:$0xff]  ;;  %s4268_s9 = smov [#allocation16]  }
 0x663   :  { %v3332_v62 = vpop.f32.mrb[189].mxu1  ;;  %s2751_s3 = sshll.u32 %s4268_s9, 4  ;;  %s2752_s3 = int_to_ptr.vmem [resolvable:$true] %s2751_s3 }
 0x664   :  { %v3333_v33 = vadd.f32 %v3332_v62, %v3331_v27  ;;  %v3334_v53 = vpop.f32.mrb[190].mxu1  ;;  %s4222_s28 = scalar_lea.vmem %s2752_s3, 4096  ;;  %p4227_p9 = scmp.lt.s32.totalorder %s2752_s3, %s2752_s3 }
 0x665   :  { %v3335_v21 = vpop.f32.mrb[191].mxu1  ;;  %p4223_p8 = scmp.ne.s32.totalorder %s2752_s3, %s4222_s28  ;;  %p4228_p10 = scmp.lt.s32.totalorder %s4222_s28, %s4222_s28 }
 0x666   :  { %v3336_v19 = vadd.f32 %v3335_v21, %v3334_v53 }
 0x667   :  { %p4229_p11 = por %p4228_p10, %p4227_p9 }
 0x668   :  { %v1959_v48 = vpack.c.bf16 %v3336_v19, %v3333_v33 }
 0x669   :  { %p4230_p12 = pnand %p4229_p11, %p4223_p8 }
 0x66a   :  { %3726 = vmatmul.mubr.bf16.gmra.mrb[76].mxu0 %v1959_v48  ;;  %v3337_v50 = vpop.f32.mrb[192].mxu1 }
 0x66b   :  { %v3338_v52 = vpop.f32.mrb[193].mxu1 }
 0x66c   :  { %v3339_v54 = vadd.f32 %v3338_v52, %v3337_v50  ;;  %v3340_v14 = vpop.f32.mrb[194].mxu1 }
 0x66d   :  { %v3341_v10 = vpop.f32.mrb[195].mxu1 }
 0x66e   :  { %v3342_v7 = vadd.f32 %v3341_v10, %v3340_v14 }
 0x670   :  { %v1960_v8 = vpack.c.bf16 %v3342_v7, %v3339_v54 }
 0x672   :  { %v3343_v38 = vpop.f32.mrb[196].mxu1  ;;  %3729 = vmatprep.mubr.bf16.mxu0 %v1960_v8 }
 0x673   :  { %v3344_v40 = vpop.f32.mrb[197].mxu1 }
 0x674   :  { %v3345_v11 = vadd.f32 %v3344_v40, %v3343_v38  ;;  %v3346_v16 = vpop.f32.mrb[198].mxu1 }
 0x675   :  { %v3347_v25 = vpop.f32.mrb[199].mxu1 }
 0x676   :  { %v3348_v18 = vadd.f32 %v3347_v25, %v3346_v16 }
 0x678   :  { %v1961_v24 = vpack.c.bf16 %v3348_v18, %v3345_v11 }
 0x67a   :  { %3730 = vmatmul.mubr.bf16.gmra.mrb[80].mxu0 %v1961_v24  ;;  %v3349_v31 = vpop.f32.mrb[200].mxu1 }
 0x67b   :  { %v3350_v0 = vpop.f32.mrb[201].mxu1 }
 0x67c   :  { %v3351_v2 = vadd.f32 %v3350_v0, %v3349_v31  ;;  %v3352_v3 = vpop.f32.mrb[202].mxu1 }
 0x67d   :  { %v3353_v4 = vpop.f32.mrb[203].mxu1 }
 0x67e   :  { %v3354_v5 = vadd.f32 %v3353_v4, %v3352_v3 }
 0x680   :  { %v1962_v6 = vpack.c.bf16 %v3354_v5, %v3351_v2 }
 0x682   :  { %v3355_v9 = vpop.f32.mrb[204].mxu1  ;;  %3733 = vmatprep.mubr.bf16.mxu0 %v1962_v6 }
 0x683   :  { %v3356_v12 = vpop.f32.mrb[205].mxu1 }
 0x684   :  { %v3357_v13 = vadd.f32 %v3356_v12, %v3355_v9  ;;  %v3358_v15 = vpop.f32.mrb[206].mxu1 }
 0x685   :  { %v3359_v17 = vpop.f32.mrb[207].mxu1 }
 0x686   :  { %v3360_v23 = vadd.f32 %v3359_v17, %v3358_v15 }
 0x688   :  { %v1963_v26 = vpack.c.bf16 %v3360_v23, %v3357_v13 }
 0x68a   :  { %3734 = vmatmul.mubr.bf16.gmra.mrb[84].mxu0 %v1963_v26  ;;  %v3361_v30 = vpop.f32.mrb[208].mxu1 }
 0x68b   :  { %v3362_v32 = vpop.f32.mrb[209].mxu1 }
 0x68c   :  { %v3363_v34 = vadd.f32 %v3362_v32, %v3361_v30  ;;  %v3364_v35 = vpop.f32.mrb[210].mxu1 }
 0x68d   :  { %v3365_v36 = vpop.f32.mrb[211].mxu1 }
 0x68e   :  { %v3366_v42 = vadd.f32 %v3365_v36, %v3364_v35 }
 0x690   :  { %v1964_v44 = vpack.c.bf16 %v3366_v42, %v3363_v34 }
 0x692   :  { %v3367_v60 = vpop.f32.mrb[212].mxu1  ;;  %3737 = vmatprep.mubr.bf16.mxu0 %v1964_v44 }
 0x693   :  { %v3368_v45 = vpop.f32.mrb[213].mxu1 }
 0x694   :  { %v3369_v49 = vadd.f32 %v3368_v45, %v3367_v60  ;;  %v3370_v58 = vpop.f32.mrb[214].mxu1 }
 0x695   :  { %v3371_v51 = vpop.f32.mrb[215].mxu1 }
 0x696   :  { %v3372_v41 = vadd.f32 %v3371_v51, %v3370_v58 }
 0x698   :  { %v1965_v37 = vpack.c.bf16 %v3372_v41, %v3369_v49 }
 0x69a   :  { %3738 = vmatmul.mubr.bf16.gmra.mrb[88].mxu0 %v1965_v37  ;;  %v3373_v61 = vpop.f32.mrb[216].mxu1 }
 0x69b   :  { %v3374_v63 = vpop.f32.mrb[217].mxu1 }
 0x69c   :  { %v3375_v47 = vadd.f32 %v3374_v63, %v3373_v61  ;;  %v3376_v22 = vpop.f32.mrb[218].mxu1 }
 0x69d   :  { %v3377_v1 = vpop.f32.mrb[219].mxu1 }
 0x69e   :  { %v3378_v28 = vadd.f32 %v3377_v1, %v3376_v22 }
 0x6a0   :  { %v1966_v59 = vpack.c.bf16 %v3378_v28, %v3375_v47 }
 0x6a2   :  { %v3379_v46 = vpop.f32.mrb[220].mxu1  ;;  %3741 = vmatprep.mubr.bf16.mxu0 %v1966_v59 }
 0x6a3   :  { %v3380_v43 = vpop.f32.mrb[221].mxu1 }
 0x6a4   :  { %v3381_v55 = vadd.f32 %v3380_v43, %v3379_v46  ;;  %v3382_v39 = vpop.f32.mrb[222].mxu1 }
 0x6a5   :  { %v3383_v29 = vpop.f32.mrb[223].mxu1 }
 0x6a6   :  { %v3384_v56 = vadd.f32 %v3383_v29, %v3382_v39 }
 0x6a8   :  { %v1967_v20 = vpack.c.bf16 %v3384_v56, %v3381_v55 }
 0x6aa   :  { %3742 = vmatmul.mubr.bf16.gmra.mrb[92].mxu0 %v1967_v20 }
 0x70d   :  { %v3715_v27 = vpop.f32.mrb[64].mxu0 }
 0x70e   :  { %v2684_v62 = vadd.f32 %v3715_v27, %v4951_v57  ;;  %v2516_v33 = vpop.f32.mrb[65].mxu0 }
 0x70f   :  { %v2682_v53 = vadd.f32 %v4951_v57, %v2516_v33  ;;  %v3716_v21 = vpop.f32.mrb[66].mxu0 }
 0x710   :  { %2716 = vst [vmem:[#allocation16 + $0x10] sm:$0xff] %v2684_v62  ;;  %v2685_v19 = vadd.f32 %v3716_v21, %v4951_v57  ;;  %v2519_v48 = vpop.f32.mrb[67].mxu0 }
 0x711   :  { %2714 = vst [vmem:[#allocation16] sm:$0xff] %v2682_v53  ;;  %v2683_v50 = vadd.f32 %v4951_v57, %v2519_v48 }
 0x712   :  { %2717 = vst [vmem:[#allocation16 + $0x18] sm:$0xff] %v2685_v19 }
 0x713   :  { %2715 = vst [vmem:[#allocation16 + $0x8] sm:$0xff] %v2683_v50 }
 0x71d   :  { %v3719_v52 = vpop.f32.mrb[68].mxu0 }
 0x71e   :  { %v2688_v54 = vadd.f32 %v3719_v52, %v4951_v57  ;;  %v2532_v14 = vpop.f32.mrb[69].mxu0 }
 0x71f   :  { %v2686_v10 = vadd.f32 %v4951_v57, %v2532_v14  ;;  %v3720_v7 = vpop.f32.mrb[70].mxu0 }
 0x720   :  { %2720 = vst [vmem:[#allocation16 + $0x30] sm:$0xff] %v2688_v54  ;;  %v2689_v8 = vadd.f32 %v3720_v7, %v4951_v57  ;;  %v2535_v38 = vpop.f32.mrb[71].mxu0 }
 0x721   :  { %2718 = vst [vmem:[#allocation16 + $0x20] sm:$0xff] %v2686_v10  ;;  %v2687_v40 = vadd.f32 %v4951_v57, %v2535_v38 }
 0x722   :  { %2721 = vst [vmem:[#allocation16 + $0x38] sm:$0xff] %v2689_v8 }
 0x723   :  { %2719 = vst [vmem:[#allocation16 + $0x28] sm:$0xff] %v2687_v40 }
 0x72d   :  { %v3723_v11 = vpop.f32.mrb[72].mxu0 }
 0x72e   :  { %v2692_v16 = vadd.f32 %v3723_v11, %v4951_v57  ;;  %v2548_v25 = vpop.f32.mrb[73].mxu0 }
 0x72f   :  { %v2690_v18 = vadd.f32 %v4951_v57, %v2548_v25  ;;  %v3724_v24 = vpop.f32.mrb[74].mxu0 }
 0x730   :  { %2724 = vst [vmem:[#allocation16 + $0x50] sm:$0xff] %v2692_v16  ;;  %v2693_v31 = vadd.f32 %v3724_v24, %v4951_v57  ;;  %v2551_v0 = vpop.f32.mrb[75].mxu0 }
 0x731   :  { %2722 = vst [vmem:[#allocation16 + $0x40] sm:$0xff] %v2690_v18  ;;  %v2691_v2 = vadd.f32 %v4951_v57, %v2551_v0 }
 0x732   :  { %2725 = vst [vmem:[#allocation16 + $0x58] sm:$0xff] %v2693_v31 }
 0x733   :  { %2723 = vst [vmem:[#allocation16 + $0x48] sm:$0xff] %v2691_v2 }
 0x73d   :  { %v3727_v3 = vpop.f32.mrb[76].mxu0 }
 0x73e   :  { %v2696_v4 = vadd.f32 %v3727_v3, %v4951_v57  ;;  %v2564_v5 = vpop.f32.mrb[77].mxu0 }
 0x73f   :  { %v2694_v6 = vadd.f32 %v4951_v57, %v2564_v5  ;;  %v3728_v9 = vpop.f32.mrb[78].mxu0 }
 0x740   :  { %2728 = vst [vmem:[#allocation16 + $0x70] sm:$0xff] %v2696_v4  ;;  %v2697_v12 = vadd.f32 %v3728_v9, %v4951_v57  ;;  %v2567_v13 = vpop.f32.mrb[79].mxu0 }
 0x741   :  { %2726 = vst [vmem:[#allocation16 + $0x60] sm:$0xff] %v2694_v6  ;;  %v2695_v15 = vadd.f32 %v4951_v57, %v2567_v13 }
 0x742   :  { %2729 = vst [vmem:[#allocation16 + $0x78] sm:$0xff] %v2697_v12 }
 0x743   :  { %2727 = vst [vmem:[#allocation16 + $0x68] sm:$0xff] %v2695_v15 }
 0x74d   :  { %v3731_v17 = vpop.f32.mrb[80].mxu0 }
 0x74e   :  { %v2700_v23 = vadd.f32 %v3731_v17, %v4951_v57  ;;  %v2580_v26 = vpop.f32.mrb[81].mxu0 }
 0x74f   :  { %v2698_v30 = vadd.f32 %v4951_v57, %v2580_v26  ;;  %v3732_v32 = vpop.f32.mrb[82].mxu0 }
 0x750   :  { %2732 = vst [vmem:[#allocation16 + $0x90] sm:$0xff] %v2700_v23  ;;  %v2701_v34 = vadd.f32 %v3732_v32, %v4951_v57  ;;  %v2583_v35 = vpop.f32.mrb[83].mxu0 }
 0x751   :  { %2730 = vst [vmem:[#allocation16 + $0x80] sm:$0xff] %v2698_v30  ;;  %v2699_v36 = vadd.f32 %v4951_v57, %v2583_v35 }
 0x752   :  { %2733 = vst [vmem:[#allocation16 + $0x98] sm:$0xff] %v2701_v34 }
 0x753   :  { %2731 = vst [vmem:[#allocation16 + $0x88] sm:$0xff] %v2699_v36 }
 0x75d   :  { %v3735_v42 = vpop.f32.mrb[84].mxu0 }
 0x75e   :  { %v2704_v44 = vadd.f32 %v3735_v42, %v4951_v57  ;;  %v2596_v60 = vpop.f32.mrb[85].mxu0 }
 0x75f   :  { %v2702_v45 = vadd.f32 %v4951_v57, %v2596_v60  ;;  %v3736_v49 = vpop.f32.mrb[86].mxu0 }
 0x760   :  { %2736 = vst [vmem:[#allocation16 + $0xb0] sm:$0xff] %v2704_v44  ;;  %v2705_v58 = vadd.f32 %v3736_v49, %v4951_v57  ;;  %v2599_v51 = vpop.f32.mrb[87].mxu0 }
 0x761   :  { %2734 = vst [vmem:[#allocation16 + $0xa0] sm:$0xff] %v2702_v45  ;;  %v2703_v41 = vadd.f32 %v4951_v57, %v2599_v51 }
 0x762   :  { %2737 = vst [vmem:[#allocation16 + $0xb8] sm:$0xff] %v2705_v58 }
 0x763   :  { %2735 = vst [vmem:[#allocation16 + $0xa8] sm:$0xff] %v2703_v41 }
 0x76d   :  { %v3739_v37 = vpop.f32.mrb[88].mxu0 }
 0x76e   :  { %v2708_v61 = vadd.f32 %v3739_v37, %v4951_v57  ;;  %v2612_v63 = vpop.f32.mrb[89].mxu0 }
 0x76f   :  { %v2706_v47 = vadd.f32 %v4951_v57, %v2612_v63  ;;  %v3740_v22 = vpop.f32.mrb[90].mxu0 }
 0x770   :  { %2740 = vst [vmem:[#allocation16 + $0xd0] sm:$0xff] %v2708_v61  ;;  %v2709_v1 = vadd.f32 %v3740_v22, %v4951_v57  ;;  %v2615_v28 = vpop.f32.mrb[91].mxu0 }
 0x771   :  { %2738 = vst [vmem:[#allocation16 + $0xc0] sm:$0xff] %v2706_v47  ;;  %v2707_v59 = vadd.f32 %v4951_v57, %v2615_v28 }
 0x772   :  { %2741 = vst [vmem:[#allocation16 + $0xd8] sm:$0xff] %v2709_v1 }
 0x773   :  { %2739 = vst [vmem:[#allocation16 + $0xc8] sm:$0xff] %v2707_v59 }
 0x77d   :  { %v3743_v46 = vpop.f32.mrb[92].mxu0 }
 0x77e   :  { %v2712_v43 = vadd.f32 %v3743_v46, %v4951_v57  ;;  %v2628_v55 = vpop.f32.mrb[93].mxu0 }
 0x77f   :  { %v2710_v39 = vadd.f32 %v4951_v57, %v2628_v55  ;;  %v3744_v29 = vpop.f32.mrb[94].mxu0 }
 0x780   :  { %2744 = vst [vmem:[#allocation16 + $0xf0] sm:$0xff] %v2712_v43  ;;  %v2713_v56 = vadd.f32 %v3744_v29, %v4951_v57  ;;  %v2631_v20 = vpop.f32.mrb[95].mxu0 }
 0x781   :  { %2742 = vst [vmem:[#allocation16 + $0xe0] sm:$0xff] %v2710_v39  ;;  %v2711_v27 = vadd.f32 %v4951_v57, %v2631_v20 }
 0x782   :  { %2745 = vst [vmem:[#allocation16 + $0xf8] sm:$0xff] %v2713_v56 }
 0x783   :  { %2743 = vst [vmem:[#allocation16 + $0xe8] sm:$0xff] %v2711_v27 }
 0x784   :  { %4233 = shalt.err (!%p4230_p12)
}
 0x785   :  { %s4234_s16 = scalar_lea.hbm %s5010_s10, 4096 }
 0x786   :  { %p4235_p13 = scmp.ne.s32.totalorder %s5010_s10, %s4234_s16  ;;  %p4238_p0 = scmp.lt.u32.totalorder %s4234_s16, %s5010_s10 }
 0x788   :  { %p4240_p1 = pnand %p4238_p0, %p4235_p13 }
 0x78a   :  { %4243 = shalt.err (!%p4240_p1)
}
 0x78b   :  { %2757 = dma.vmem_to_hbm [thread:$0]  %s2752_s3, 4096, %s5010_s10, [#allocation4], %s4262_s6, %s4262_s6, %s4263_s30  }
 0x78c   :  { %4254 = dma.done.wait [#allocation4], 4096  }
 0x78d   :  { %4255 = vsyncadd [#allocation4], 4294963200 }
 0x78e   :  { %2761 = vsyncpa [#allocation3], 1 }
 0x78f   :  { %2762 = vsyncpa [#allocation6], 1 }
 0x790   :  { %2763 = vsyncpa [#allocation9], 1 }
 0x791   :  { %2764 = vsyncpa [#allocation12], 1 }
 0x792   :  { %2765 = vsyncpa [#allocation15], 1 }
 0x793   :  { %2766 = vsyncpa [#allocation4], 1 }

</bundles_post_ra>
